<compile_context>
chip_gen: v7x
topology: tpu7x:2x2x1
jax: 0.10.0
libtpu: 0.0.40
codegen_flags: <defaults>
</compile_context>

<pallas_src>
import functools

import jax
import jax.numpy as jnp
from jax.experimental import pallas as pl
from jax.experimental.pallas import tpu as pltpu


def _round_up(x, m):
    return (x + m - 1) // m * m


def _pad_to(a, shape):
    pads = [(0, s - d) for d, s in zip(a.shape, shape)]
    if all(hi == 0 for _, hi in pads):
        return a
    return jnp.pad(a, pads)


@functools.lru_cache(maxsize=None)
def _vmem_limit_bytes():
    """Per-chip VMEM budget with headroom (~48 MiB v7x, ~96 MiB v5e/v6e)."""
    cap = None
    try:
        cap = getattr(pltpu.get_tpu_info(), "vmem_capacity_bytes", None)
    except Exception:
        cap = None
    if not cap:
        return 48 * 1024 * 1024          # safe everywhere (v7x has 64 MiB/TC)
    return int(min(max(cap * 3 // 4, 32 * 1024 * 1024), 100 * 1024 * 1024))


def _choose_mn_tile(dim, tmax):
    """(tile, padded_dim) for an M/N axis: full-extent block if it fits (no
    padding, legal for any size), otherwise aligned tmax tiles."""
    if dim <= tmax:
        return dim, dim
    return tmax, _round_up(dim, tmax)


def _choose_k_tile(K, tkmax):
    """(tile, padded_K): prefer an exact multiple-of-128 divisor of K; fall
    back to an un-tiled full-extent K block (legal, avoids padding copies)."""
    if K <= tkmax or K % 128 != 0:
        return K, K
    for t in range(tkmax, 127, -128):
        if K % t == 0:
            return t, K
    return K, K


# ---------------------------------------------------------------------------
# Fused (LayerNorm?) -> matmul(bf16, f32 acc) -> +bias -> (GELU?) -> (+residual?)
# ---------------------------------------------------------------------------

def _fused_matmul_kernel(*refs, fuse_ln, fuse_residual, activation, ln_eps,
                         multi_k, use_acc_scratch):
    it = iter(refs)
    x_ref = next(it)
    w_ref = next(it)
    b_ref = next(it)
    g_ref = next(it) if fuse_ln else None
    bb_ref = next(it) if fuse_ln else None
    r_ref = next(it) if fuse_residual else None
    o_ref = next(it)
    xln_ref = next(it) if fuse_ln else None
    acc_scr = next(it) if use_acc_scratch else None

    j_idx = pl.program_id(1)
    k_idx = pl.program_id(2)

    # ---- LHS tile for the MXU (bf16) ----
    if fuse_ln:
        # LayerNorm over the full (un-tiled) feature dim, computed once per
        # M-tile and cached in VMEM; reused for every N tile (j axis is
        # "arbitrary" for these calls so each core sees j=0 first).
        @pl.when(j_idx == 0)
        def _():
            x = x_ref[...].astype(jnp.float32)
            mean = jnp.mean(x, axis=-1, keepdims=True)
            var = jnp.mean(jnp.square(x - mean), axis=-1, keepdims=True)
            x = (x - mean) * jax.lax.rsqrt(var + ln_eps)
            x = x * g_ref[...] + bb_ref[...]
            xln_ref[...] = x.astype(jnp.bfloat16)
        x_bf = xln_ref[...]
    else:
        x_bf = x_ref[...].astype(jnp.bfloat16)

    w_bf = w_ref[...].astype(jnp.bfloat16)
    part = jnp.dot(x_bf, w_bf, preferred_element_type=jnp.float32)

    def _finalize(acc):
        y = acc + b_ref[...]
        if activation == "gelu":
            # exact (erf) GELU, matching torch.nn.GELU() default
            y = 0.5 * y * (1.0 + jax.lax.erf(y * 0.7071067811865476))
        if fuse_residual:
            y = y + r_ref[...].astype(jnp.float32)
        o_ref[...] = y.astype(o_ref.dtype)

    if not multi_k:
        # Single K step: no accumulator needed at all.
        _finalize(part)
        return

    # Multi K step: accumulate in f32.  If the output is f32, its block is
    # resident across the K axis (index_map ignores k) -> accumulate in-place.
    acc_ref = acc_scr if use_acc_scratch else o_ref

    @pl.when(k_idx == 0)
    def _():
        acc_ref[...] = jnp.zeros_like(acc_ref)

    acc_ref[...] += part

    @pl.when(k_idx == pl.num_programs(2) - 1)
    def _():
        _finalize(acc_ref[...])


def fused_matmul(x, w, b, *, ln_gamma=None, ln_beta=None, residual=None,
                 activation=None, ln_eps=1e-5, out_dtype=jnp.float32,
                 tm_max=512, tn_max=512, tk_max=512):
    """y = [residual +] act(LN?(x) @ w + b).  x:(M,K) w:(K,N) b:(N,)."""
    M, K = x.shape
    K2, N = w.shape
    assert K == K2
    fuse_ln = ln_gamma is not None
    fuse_res = residual is not None

    tm, Mp = _choose_mn_tile(M, tm_max)
    tn, Np = _choose_mn_tile(N, tn_max)
    if fuse_ln:
        # LayerNorm needs full feature rows: K stays un-tiled / un-padded.
        tk, Kp = K, K
    else:
        tk, Kp = _choose_k_tile(K, tk_max)

    n_k = Kp // tk
    multi_k = n_k > 1
    use_acc_scratch = multi_k and (jnp.dtype(out_dtype) != jnp.dtype(jnp.float32))

    xp = _pad_to(x, (Mp, Kp))
    wp = _pad_to(w, (Kp, Np))
    bp = _pad_to(b.reshape(1, N).astype(jnp.float32), (1, Np))

    inputs = [xp, wp, bp]
    in_specs = [
        pl.BlockSpec((tm, tk), lambda i, j, k: (i, k)),
        pl.BlockSpec((tk, tn), lambda i, j, k: (k, j)),
        pl.BlockSpec((1, tn), lambda i, j, k: (0, j)),
    ]
    if fuse_ln:
        inputs += [ln_gamma.reshape(1, K).astype(jnp.float32),
                   ln_beta.reshape(1, K).astype(jnp.float32)]
        in_specs += [pl.BlockSpec((1, K), lambda i, j, k: (0, 0)),
                     pl.BlockSpec((1, K), lambda i, j, k: (0, 0))]
    if fuse_res:
        inputs.append(_pad_to(residual, (Mp, Np)))
        in_specs.append(pl.BlockSpec((tm, tn), lambda i, j, k: (i, j)))

    scratch_shapes = []
    if fuse_ln:
        scratch_shapes.append(pltpu.VMEM((tm, K), jnp.bfloat16))   # cached LN rows
    if use_acc_scratch:
        scratch_shapes.append(pltpu.VMEM((tm, tn), jnp.float32))

    kern = functools.partial(_fused_matmul_kernel, fuse_ln=fuse_ln,
                             fuse_residual=fuse_res, activation=activation,
                             ln_eps=ln_eps, multi_k=multi_k,
                             use_acc_scratch=use_acc_scratch)

    # The LN cache requires the j (N-tile) axis to run sequentially per core.
    dims = (("parallel", "arbitrary", "arbitrary") if fuse_ln
            else ("parallel", "parallel", "arbitrary"))

    flops = 2 * Mp * Np * Kp
    trans = Mp * Np if activation == "gelu" else 0
    bytes_accessed = int(Mp * Kp * xp.dtype.itemsize
                         + Kp * Np * wp.dtype.itemsize
                         + Mp * Np * jnp.dtype(out_dtype).itemsize
                         * (2 if fuse_res else 1))

    out = pl.pallas_call(
        kern,
        out_shape=jax.ShapeDtypeStruct((Mp, Np), out_dtype),
        grid=(Mp // tm, Np // tn, n_k),
        in_specs=in_specs,
        out_specs=pl.BlockSpec((tm, tn), lambda i, j, k: (i, j)),
        scratch_shapes=scratch_shapes,
        compiler_params=pltpu.CompilerParams(
            dimension_semantics=dims,
            vmem_limit_bytes=_vmem_limit_bytes()),
        cost_estimate=pl.CostEstimate(flops=flops, transcendentals=trans,
                                      bytes_accessed=bytes_accessed),
    )(*inputs)
    if Mp != M or Np != N:
        out = out[:M, :N]
    return out


# ---------------------------------------------------------------------------
# Attention core: reads q/k/v straight out of the packed (B, T, 3D) qkv tensor,
# writes a lane-dense (B, T, D) output in (token, head*hd) layout.
# ---------------------------------------------------------------------------

def _attn_kernel(qkv_ref, o_ref, *, n_heads, head_dim, scale):
    D = n_heads * head_dim
    # TODO(synk): for large token counts (high-res ViT) switch to a KV-tiled
    # online-softmax (flash-style) path; here T is small and (T, T) fits VMEM.
    for h in range(n_heads):
        lo = h * head_dim
        q = qkv_ref[0, :, lo:lo + head_dim]                  # (T, hd) bf16
        k = qkv_ref[0, :, D + lo:D + lo + head_dim]
        v = qkv_ref[0, :, 2 * D + lo:2 * D + lo + head_dim]
        # contract on the matching minor dims (no materialized transpose)
        s = jax.lax.dot_general(q, k, (((1,), (1,)), ((), ())),
                                preferred_element_type=jnp.float32) * scale
        m = jnp.max(s, axis=-1, keepdims=True)
        p = jnp.exp(s - m)
        denom = jnp.sum(p, axis=-1, keepdims=True)
        # normalize AFTER the PV matmul: T*hd multiplies instead of T*T
        o_un = jnp.dot(p.astype(jnp.bfloat16), v,
                       preferred_element_type=jnp.float32)   # (T, hd)
        o = o_un * pl.reciprocal(denom, approx=True)
        o_ref[0, :, lo:lo + head_dim] = o.astype(o_ref.dtype)


def attention(qkv, *, n_heads, head_dim, scale):
    """qkv: (B, T, 3*D) bf16 -> (B, T, D) bf16 (layout matches torch's
    weighted_avg.transpose(1, 2).flatten(2), i.e. directly consumable by proj)."""
    B, T, threeD = qkv.shape
    D = n_heads * head_dim
    assert threeD == 3 * D
    kern = functools.partial(_attn_kernel, n_heads=n_heads,
                             head_dim=head_dim, scale=scale)
    return pl.pallas_call(
        kern,
        out_shape=jax.ShapeDtypeStruct((B, T, D), jnp.bfloat16),
        grid=(B,),
        in_specs=[pl.BlockSpec((1, T, threeD), lambda b: (b, 0, 0))],
        out_specs=pl.BlockSpec((1, T, D), lambda b: (b, 0, 0)),
        compiler_params=pltpu.CompilerParams(
            dimension_semantics=("parallel",),
            vmem_limit_bytes=_vmem_limit_bytes()),
        cost_estimate=pl.CostEstimate(
            flops=4 * B * n_heads * T * T * head_dim,
            transcendentals=B * n_heads * T * T,
            bytes_accessed=int(B * T * threeD * 2 + B * T * D * 2)),
    )(qkv)


# ---------------------------------------------------------------------------
# Parameter initialization (deterministic, synthetic). Matmul weights in bf16.
# ---------------------------------------------------------------------------

def init_params(key, *, img_size, patch_size, n_classes, emb_dim, depth,
                n_heads, mlp_ratio):
    n_patches = (img_size // patch_size) ** 2
    hidden = int(emb_dim * mlp_ratio)
    patch_in = 3 * patch_size * patch_size

    def nrm(k, shape, std=0.02, dtype=jnp.bfloat16):
        return (jax.random.normal(k, shape, dtype=jnp.float32) * std).astype(dtype)

    keys = jax.random.split(key, 4 + depth)
    params = {
        # conv weight stored already flattened & transposed: (3*p*p, emb_dim)
        "patch_w": nrm(keys[0], (patch_in, emb_dim)),
        "patch_b": jnp.zeros((emb_dim,), jnp.float32),
        "cls_token": nrm(keys[1], (1, 1, emb_dim), std=1.0, dtype=jnp.float32),
        "pos_embed": nrm(keys[2], (1, 1 + n_patches, emb_dim), std=1.0, dtype=jnp.float32),
        "ln_g": jnp.ones((emb_dim,), jnp.float32),
        "ln_b": jnp.zeros((emb_dim,), jnp.float32),
        "head_w": nrm(keys[3], (emb_dim, n_classes)),
        "head_b": jnp.zeros((n_classes,), jnp.float32),
        "blocks": [],
    }
    for d in range(depth):
        bk = jax.random.split(keys[4 + d], 4)
        params["blocks"].append({
            "ln1_g": jnp.ones((emb_dim,), jnp.float32),
            "ln1_b": jnp.zeros((emb_dim,), jnp.float32),
            "qkv_w": nrm(bk[0], (emb_dim, 3 * emb_dim)),          # bias=False in spec
            "proj_w": nrm(bk[1], (emb_dim, emb_dim)),
            "proj_b": jnp.zeros((emb_dim,), jnp.float32),
            "ln2_g": jnp.ones((emb_dim,), jnp.float32),
            "ln2_b": jnp.zeros((emb_dim,), jnp.float32),
            "fc1_w": nrm(bk[2], (emb_dim, hidden)),
            "fc1_b": jnp.zeros((hidden,), jnp.float32),
            "fc2_w": nrm(bk[3], (hidden, emb_dim)),
            "fc2_b": jnp.zeros((emb_dim,), jnp.float32),
        })
    return params


# ---------------------------------------------------------------------------
# Forward pass
# ---------------------------------------------------------------------------

def vit_forward(x, params, *, patch_size, emb_dim, n_heads):
    B, C, H, W = x.shape
    p = patch_size
    Hp, Wp = H // p, W // p
    head_dim = emb_dim // n_heads
    scale = head_dim ** -0.5

    # --- patch embedding: Conv2d(k=stride=p) == per-patch flatten + matmul ---
    patches = x.reshape(B, C, Hp, p, Wp, p).transpose(0, 2, 4, 1, 3, 5)
    patches = patches.reshape(B * Hp * Wp, C * p * p)
    emb = fused_matmul(patches, params["patch_w"], params["patch_b"])
    emb = emb.reshape(B, Hp * Wp, emb_dim)

    # --- cls token + positional embedding (residual stream kept f32) ---
    cls = jnp.broadcast_to(params["cls_token"], (B, 1, emb_dim))
    tokens = jnp.concatenate([cls, emb], axis=1) + params["pos_embed"]
    T = tokens.shape[1]
    M = B * T
    # TODO(synk): dropout (pos_drop / proj_drop / mlp drop) omitted — p=0.0 (identity).

    zero_qkv_b = jnp.zeros((3 * emb_dim,), jnp.float32)
    for blk in params["blocks"]:
        x2d = tokens.reshape(M, emb_dim)

        # --- attention sub-block: LN1 fused into the QKV matmul, qkv emitted bf16 ---
        qkv = fused_matmul(x2d, blk["qkv_w"], zero_qkv_b,
                           ln_gamma=blk["ln1_g"], ln_beta=blk["ln1_b"],
                           out_dtype=jnp.bfloat16)
        o = attention(qkv.reshape(B, T, 3 * emb_dim),
                      n_heads=n_heads, head_dim=head_dim, scale=scale)
        # proj matmul with the residual add fused in-kernel (residual stream f32)
        x2d = fused_matmul(o.reshape(M, emb_dim), blk["proj_w"], blk["proj_b"],
                           residual=x2d)

        # --- MLP sub-block: LN2+GELU fused into fc1 (bf16 out), residual into fc2 ---
        h = fused_matmul(x2d, blk["fc1_w"], blk["fc1_b"],
                         ln_gamma=blk["ln2_g"], ln_beta=blk["ln2_b"],
                         activation="gelu", out_dtype=jnp.bfloat16)
        x2d = fused_matmul(h, blk["fc2_w"], blk["fc2_b"], residual=x2d)
        tokens = x2d.reshape(B, T, emb_dim)

    # --- final norm + classification head: LN fused into the head matmul;
    #     LayerNorm is row-wise so applying it only to the cls rows is equivalent ---
    cls_final = tokens[:, 0, :]                       # (B, D)
    logits = fused_matmul(cls_final, params["head_w"], params["head_b"],
                          ln_gamma=params["ln_g"], ln_beta=params["ln_b"])
    return logits


# ---------------------------------------------------------------------------
# Main
# ---------------------------------------------------------------------------

if __name__ == "__main__":
    # small config consistent with VisionTransformer semantics
    IMG, PATCH, EMB, DEPTH, HEADS, MLP_RATIO, NCLS, BATCH = 32, 8, 64, 2, 4, 4.0, 10, 2

    key = jax.random.PRNGKey(0)
    k_params, k_x = jax.random.split(key)
    params = init_params(k_params, img_size=IMG, patch_size=PATCH,
                         n_classes=NCLS, emb_dim=EMB, depth=DEPTH,
                         n_heads=HEADS, mlp_ratio=MLP_RATIO)
    x = jax.random.normal(k_x, (BATCH, 3, IMG, IMG), dtype=jnp.float32)

    fwd = jax.jit(functools.partial(vit_forward, patch_size=PATCH,
                                    emb_dim=EMB, n_heads=HEADS))
    logits = fwd(x, params)
    jax.block_until_ready(logits)
    assert logits.shape == (BATCH, NCLS), logits.shape
    print("KERNEL_OK")
</pallas_src>

<mosaic_0001>
module attributes {stable_mosaic.version = 11 : i64} {
  func.func @_fused_matmul_kernel(%arg0: i32, %arg1: i32, %arg2: i32, %arg3: memref<32x192xf32, #tpu.memory_space<vmem>>, %arg4: memref<192x64xbf16, #tpu.memory_space<vmem>>, %arg5: memref<1x64xf32, #tpu.memory_space<vmem>>, %arg6: memref<32x64xf32, #tpu.memory_space<vmem>>) attributes {dimension_semantics = [#tpu.dimension_semantics<parallel>, #tpu.dimension_semantics<parallel>, #tpu.dimension_semantics<arbitrary>], iteration_bounds = array<i64: 1, 1, 1>, scalar_prefetch = 0 : i64, scratch_operands = 0 : i64, tpu.core_type = #tpu.core_type<tc>, window_params = [{transform_indices = @transform_0, window_bounds = array<i64: 32, 192>}, {transform_indices = @transform_1, window_bounds = array<i64: 192, 64>}, {transform_indices = @transform_2, window_bounds = array<i64: 1, 64>}, {transform_indices = @transform_3, window_bounds = array<i64: 32, 64>}]} {
    %c0 = arith.constant 0 : index
    %c0_0 = arith.constant 0 : index
    %0 = vector.load %arg3[%c0, %c0_0] : memref<32x192xf32, #tpu.memory_space<vmem>>, vector<32x192xf32>
    %1 = arith.truncf %0 : vector<32x192xf32> to vector<32x192xbf16>
    %c0_1 = arith.constant 0 : index
    %c0_2 = arith.constant 0 : index
    %2 = vector.load %arg4[%c0_1, %c0_2] : memref<192x64xbf16, #tpu.memory_space<vmem>>, vector<192x64xbf16>
    %cst = arith.constant dense<0.000000e+00> : vector<32x64xf32>
    %3 = tpu.matmul %1, %2, %cst {dimension_numbers = #tpu.dot_dimension_numbers<[1], [0], [0], [1], [0, 0, 1, 1], [], []>} : vector<32x192xbf16>, vector<192x64xbf16>, vector<32x64xf32> -> vector<32x64xf32>
    %c0_3 = arith.constant 0 : index
    %c0_4 = arith.constant 0 : index
    %4 = vector.load %arg5[%c0_3, %c0_4] : memref<1x64xf32, #tpu.memory_space<vmem>>, vector<1x64xf32>
    %5 = vector.broadcast %4 : vector<1x64xf32> to vector<32x64xf32>
    %6 = arith.addf %3, %5 : vector<32x64xf32>
    %c0_5 = arith.constant 0 : index
    %c0_6 = arith.constant 0 : index
    %7 = vector.load %arg6[%c0_5, %c0_6] : memref<32x64xf32, #tpu.memory_space<vmem>>, vector<32x64xf32>
    tpu.vector_store %arg6[%c0_5, %c0_6], %6 {strides = array<i32>} : memref<32x64xf32, #tpu.memory_space<vmem>>, vector<32x64xf32>,
    return
  }
  func.func @transform_0(%arg0: i32, %arg1: i32, %arg2: i32) -> (i32, i32) {
    %c0_i32 = arith.constant 0 : i32
    return %arg0, %arg2 : i32, i32
  }
  func.func @transform_1(%arg0: i32, %arg1: i32, %arg2: i32) -> (i32, i32) {
    %c0_i32 = arith.constant 0 : i32
    return %arg2, %arg1 : i32, i32
  }
  func.func @transform_2(%arg0: i32, %arg1: i32, %arg2: i32) -> (i32, i32) {
    %c0_i32 = arith.constant 0 : i32
    %c0_i32_0 = arith.constant 0 : i32
    return %c0_i32, %arg1 : i32, i32
  }
  func.func @transform_3(%arg0: i32, %arg1: i32, %arg2: i32) -> (i32, i32) {
    %c0_i32 = arith.constant 0 : i32
    return %arg0, %arg1 : i32, i32
  }
}

module attributes {stable_mosaic.version = 11 : i64} {
  func.func @_attn_kernel(%arg0: i32, %arg1: memref<1x17x192xbf16, #tpu.memory_space<vmem>>, %arg2: memref<1x17x64xbf16, #tpu.memory_space<vmem>>) attributes {dimension_semantics = [#tpu.dimension_semantics<parallel>], iteration_bounds = array<i64: 2>, scalar_prefetch = 0 : i64, scratch_operands = 0 : i64, tpu.core_type = #tpu.core_type<tc>, window_params = [{transform_indices = @transform_0, window_bounds = array<i64: 1, 17, 192>}, {transform_indices = @transform_1, window_bounds = array<i64: 1, 17, 64>}]} {
    %c0 = arith.constant 0 : index
    %c0_0 = arith.constant 0 : index
    %c0_1 = arith.constant 0 : index
    %0 = vector.load %arg1[%c0, %c0_0, %c0_1] : memref<1x17x192xbf16, #tpu.memory_space<vmem>>, vector<1x17x16xbf16>
    %1 = vector.shape_cast %0 : vector<1x17x16xbf16> to vector<17x16xbf16>
    %c0_2 = arith.constant 0 : index
    %c0_3 = arith.constant 0 : index
    %c64 = arith.constant 64 : index
    %2 = vector.load %arg1[%c0_2, %c0_3, %c64] : memref<1x17x192xbf16, #tpu.memory_space<vmem>>, vector<1x17x16xbf16>
    %3 = vector.shape_cast %2 : vector<1x17x16xbf16> to vector<17x16xbf16>
    %c0_4 = arith.constant 0 : index
    %c0_5 = arith.constant 0 : index
    %c128 = arith.constant 128 : index
    %4 = vector.load %arg1[%c0_4, %c0_5, %c128] : memref<1x17x192xbf16, #tpu.memory_space<vmem>>, vector<1x17x16xbf16>
    %5 = vector.shape_cast %4 : vector<1x17x16xbf16> to vector<17x16xbf16>
    %cst = arith.constant dense<0.000000e+00> : vector<17x17xf32>
    %6 = tpu.matmul %1, %3, %cst {dimension_numbers = #tpu.dot_dimension_numbers<[1], [1], [0], [0], [0, 0, 1, 0], [], []>} : vector<17x16xbf16>, vector<17x16xbf16>, vector<17x17xf32> -> vector<17x17xf32>
    %cst_6 = arith.constant 2.500000e-01 : f32
    %7 = vector.broadcast %cst_6 : f32 to vector<17x17xf32>
    %8 = arith.mulf %6, %7 : vector<17x17xf32>
    %cst_7 = arith.constant dense<0xFF800000> : vector<17xf32>
    %9 = vector.multi_reduction <maximumf>, %8, %cst_7 [1] : vector<17x17xf32> to vector<17xf32>
    %10 = vector.shape_cast %9 : vector<17xf32> to vector<17x1xf32>
    %11 = vector.broadcast %10 : vector<17x1xf32> to vector<17x17xf32>
    %12 = arith.subf %8, %11 : vector<17x17xf32>
    %13 = math.exp %12 : vector<17x17xf32>
    %cst_8 = arith.constant dense<0.000000e+00> : vector<17xf32>
    %14 = vector.multi_reduction <add>, %13, %cst_8 [1] : vector<17x17xf32> to vector<17xf32>
    %15 = vector.shape_cast %14 : vector<17xf32> to vector<17x1xf32>
    %16 = arith.truncf %13 : vector<17x17xf32> to vector<17x17xbf16>
    %cst_9 = arith.constant dense<0.000000e+00> : vector<17x16xf32>
    %17 = tpu.matmul %16, %5, %cst_9 {dimension_numbers = #tpu.dot_dimension_numbers<[1], [0], [0], [1], [0, 0, 1, 1], [], []>} : vector<17x17xbf16>, vector<17x16xbf16>, vector<17x16xf32> -> vector<17x16xf32>
    %18 = tpu.reciprocal %15 {approx = true} : vector<17x1xf32> -> vector<17x1xf32>
    %19 = vector.broadcast %18 : vector<17x1xf32> to vector<17x16xf32>
    %20 = arith.mulf %17, %19 : vector<17x16xf32>
    %21 = arith.truncf %20 : vector<17x16xf32> to vector<17x16xbf16>
    %c0_10 = arith.constant 0 : index
    %c0_11 = arith.constant 0 : index
    %c0_12 = arith.constant 0 : index
    %22 = vector.load %arg2[%c0_10, %c0_11, %c0_12] : memref<1x17x64xbf16, #tpu.memory_space<vmem>>, vector<1x17x16xbf16>
    %23 = vector.shape_cast %22 : vector<1x17x16xbf16> to vector<17x16xbf16>
    %24 = vector.shape_cast %21 : vector<17x16xbf16> to vector<1x17x16xbf16>
    tpu.vector_store %arg2[%c0_10, %c0_11, %c0_12], %24 {strides = array<i32>} : memref<1x17x64xbf16, #tpu.memory_space<vmem>>, vector<1x17x16xbf16>,
    %c0_13 = arith.constant 0 : index
    %c0_14 = arith.constant 0 : index
    %c16 = arith.constant 16 : index
    %25 = vector.load %arg1[%c0_13, %c0_14, %c16] : memref<1x17x192xbf16, #tpu.memory_space<vmem>>, vector<1x17x16xbf16>
    %26 = vector.shape_cast %25 : vector<1x17x16xbf16> to vector<17x16xbf16>
    %c0_15 = arith.constant 0 : index
    %c0_16 = arith.constant 0 : index
    %c80 = arith.constant 80 : index
    %27 = vector.load %arg1[%c0_15, %c0_16, %c80] : memref<1x17x192xbf16, #tpu.memory_space<vmem>>, vector<1x17x16xbf16>
    %28 = vector.shape_cast %27 : vector<1x17x16xbf16> to vector<17x16xbf16>
    %c0_17 = arith.constant 0 : index
    %c0_18 = arith.constant 0 : index
    %c144 = arith.constant 144 : index
    %29 = vector.load %arg1[%c0_17, %c0_18, %c144] : memref<1x17x192xbf16, #tpu.memory_space<vmem>>, vector<1x17x16xbf16>
    %30 = vector.shape_cast %29 : vector<1x17x16xbf16> to vector<17x16xbf16>
    %cst_19 = arith.constant dense<0.000000e+00> : vector<17x17xf32>
    %31 = tpu.matmul %26, %28, %cst_19 {dimension_numbers = #tpu.dot_dimension_numbers<[1], [1], [0], [0], [0, 0, 1, 0], [], []>} : vector<17x16xbf16>, vector<17x16xbf16>, vector<17x17xf32> -> vector<17x17xf32>
    %cst_20 = arith.constant 2.500000e-01 : f32
    %32 = vector.broadcast %cst_20 : f32 to vector<17x17xf32>
    %33 = arith.mulf %31, %32 : vector<17x17xf32>
    %cst_21 = arith.constant dense<0xFF800000> : vector<17xf32>
    %34 = vector.multi_reduction <maximumf>, %33, %cst_21 [1] : vector<17x17xf32> to vector<17xf32>
    %35 = vector.shape_cast %34 : vector<17xf32> to vector<17x1xf32>
    %36 = vector.broadcast %35 : vector<17x1xf32> to vector<17x17xf32>
    %37 = arith.subf %33, %36 : vector<17x17xf32>
    %38 = math.exp %37 : vector<17x17xf32>
    %cst_22 = arith.constant dense<0.000000e+00> : vector<17xf32>
    %39 = vector.multi_reduction <add>, %38, %cst_22 [1] : vector<17x17xf32> to vector<17xf32>
    %40 = vector.shape_cast %39 : vector<17xf32> to vector<17x1xf32>
    %41 = arith.truncf %38 : vector<17x17xf32> to vector<17x17xbf16>
    %cst_23 = arith.constant dense<0.000000e+00> : vector<17x16xf32>
    %42 = tpu.matmul %41, %30, %cst_23 {dimension_numbers = #tpu.dot_dimension_numbers<[1], [0], [0], [1], [0, 0, 1, 1], [], []>} : vector<17x17xbf16>, vector<17x16xbf16>, vector<17x16xf32> -> vector<17x16xf32>
    %43 = tpu.reciprocal %40 {approx = true} : vector<17x1xf32> -> vector<17x1xf32>
    %44 = vector.broadcast %43 : vector<17x1xf32> to vector<17x16xf32>
    %45 = arith.mulf %42, %44 : vector<17x16xf32>
    %46 = arith.truncf %45 : vector<17x16xf32> to vector<17x16xbf16>
    %c0_24 = arith.constant 0 : index
    %c0_25 = arith.constant 0 : index
    %c16_26 = arith.constant 16 : index
    %47 = vector.load %arg2[%c0_24, %c0_25, %c16_26] : memref<1x17x64xbf16, #tpu.memory_space<vmem>>, vector<1x17x16xbf16>
    %48 = vector.shape_cast %47 : vector<1x17x16xbf16> to vector<17x16xbf16>
    %49 = vector.shape_cast %46 : vector<17x16xbf16> to vector<1x17x16xbf16>
    tpu.vector_store %arg2[%c0_24, %c0_25, %c16_26], %49 {strides = array<i32>} : memref<1x17x64xbf16, #tpu.memory_space<vmem>>, vector<1x17x16xbf16>,
    %c0_27 = arith.constant 0 : index
    %c0_28 = arith.constant 0 : index
    %c32 = arith.constant 32 : index
    %50 = vector.load %arg1[%c0_27, %c0_28, %c32] : memref<1x17x192xbf16, #tpu.memory_space<vmem>>, vector<1x17x16xbf16>
    %51 = vector.shape_cast %50 : vector<1x17x16xbf16> to vector<17x16xbf16>
    %c0_29 = arith.constant 0 : index
    %c0_30 = arith.constant 0 : index
    %c96 = arith.constant 96 : index
    %52 = vector.load %arg1[%c0_29, %c0_30, %c96] : memref<1x17x192xbf16, #tpu.memory_space<vmem>>, vector<1x17x16xbf16>
    %53 = vector.shape_cast %52 : vector<1x17x16xbf16> to vector<17x16xbf16>
    %c0_31 = arith.constant 0 : index
    %c0_32 = arith.constant 0 : index
    %c160 = arith.constant 160 : index
    %54 = vector.load %arg1[%c0_31, %c0_32, %c160] : memref<1x17x192xbf16, #tpu.memory_space<vmem>>, vector<1x17x16xbf16>
    %55 = vector.shape_cast %54 : vector<1x17x16xbf16> to vector<17x16xbf16>
    %cst_33 = arith.constant dense<0.000000e+00> : vector<17x17xf32>
    %56 = tpu.matmul %51, %53, %cst_33 {dimension_numbers = #tpu.dot_dimension_numbers<[1], [1], [0], [0], [0, 0, 1, 0], [], []>} : vector<17x16xbf16>, vector<17x16xbf16>, vector<17x17xf32> -> vector<17x17xf32>
    %cst_34 = arith.constant 2.500000e-01 : f32
    %57 = vector.broadcast %cst_34 : f32 to vector<17x17xf32>
    %58 = arith.mulf %56, %57 : vector<17x17xf32>
    %cst_35 = arith.constant dense<0xFF800000> : vector<17xf32>
    %59 = vector.multi_reduction <maximumf>, %58, %cst_35 [1] : vector<17x17xf32> to vector<17xf32>
    %60 = vector.shape_cast %59 : vector<17xf32> to vector<17x1xf32>
    %61 = vector.broadcast %60 : vector<17x1xf32> to vector<17x17xf32>
    %62 = arith.subf %58, %61 : vector<17x17xf32>
    %63 = math.exp %62 : vector<17x17xf32>
    %cst_36 = arith.constant dense<0.000000e+00> : vector<17xf32>
    %64 = vector.multi_reduction <add>, %63, %cst_36 [1] : vector<17x17xf32> to vector<17xf32>
    %65 = vector.shape_cast %64 : vector<17xf32> to vector<17x1xf32>
    %66 = arith.truncf %63 : vector<17x17xf32> to vector<17x17xbf16>
    %cst_37 = arith.constant dense<0.000000e+00> : vector<17x16xf32>
    %67 = tpu.matmul %66, %55, %cst_37 {dimension_numbers = #tpu.dot_dimension_numbers<[1], [0], [0], [1], [0, 0, 1, 1], [], []>} : vector<17x17xbf16>, vector<17x16xbf16>, vector<17x16xf32> -> vector<17x16xf32>
    %68 = tpu.reciprocal %65 {approx = true} : vector<17x1xf32> -> vector<17x1xf32>
    %69 = vector.broadcast %68 : vector<17x1xf32> to vector<17x16xf32>
    %70 = arith.mulf %67, %69 : vector<17x16xf32>
    %71 = arith.truncf %70 : vector<17x16xf32> to vector<17x16xbf16>
    %c0_38 = arith.constant 0 : index
    %c0_39 = arith.constant 0 : index
    %c32_40 = arith.constant 32 : index
    %72 = vector.load %arg2[%c0_38, %c0_39, %c32_40] : memref<1x17x64xbf16, #tpu.memory_space<vmem>>, vector<1x17x16xbf16>
    %73 = vector.shape_cast %72 : vector<1x17x16xbf16> to vector<17x16xbf16>
    %74 = vector.shape_cast %71 : vector<17x16xbf16> to vector<1x17x16xbf16>
    tpu.vector_store %arg2[%c0_38, %c0_39, %c32_40], %74 {strides = array<i32>} : memref<1x17x64xbf16, #tpu.memory_space<vmem>>, vector<1x17x16xbf16>,
    %c0_41 = arith.constant 0 : index
    %c0_42 = arith.constant 0 : index
    %c48 = arith.constant 48 : index
    %75 = vector.load %arg1[%c0_41, %c0_42, %c48] : memref<1x17x192xbf16, #tpu.memory_space<vmem>>, vector<1x17x16xbf16>
    %76 = vector.shape_cast %75 : vector<1x17x16xbf16> to vector<17x16xbf16>
    %c0_43 = arith.constant 0 : index
    %c0_44 = arith.constant 0 : index
    %c112 = arith.constant 112 : index
    %77 = vector.load %arg1[%c0_43, %c0_44, %c112] : memref<1x17x192xbf16, #tpu.memory_space<vmem>>, vector<1x17x16xbf16>
    %78 = vector.shape_cast %77 : vector<1x17x16xbf16> to vector<17x16xbf16>
    %c0_45 = arith.constant 0 : index
    %c0_46 = arith.constant 0 : index
    %c176 = arith.constant 176 : index
    %79 = vector.load %arg1[%c0_45, %c0_46, %c176] : memref<1x17x192xbf16, #tpu.memory_space<vmem>>, vector<1x17x16xbf16>
    %80 = vector.shape_cast %79 : vector<1x17x16xbf16> to vector<17x16xbf16>
    %cst_47 = arith.constant dense<0.000000e+00> : vector<17x17xf32>
    %81 = tpu.matmul %76, %78, %cst_47 {dimension_numbers = #tpu.dot_dimension_numbers<[1], [1], [0], [0], [0, 0, 1, 0], [], []>} : vector<17x16xbf16>, vector<17x16xbf16>, vector<17x17xf32> -> vector<17x17xf32>
    %cst_48 = arith.constant 2.500000e-01 : f32
    %82 = vector.broadcast %cst_48 : f32 to vector<17x17xf32>
    %83 = arith.mulf %81, %82 : vector<17x17xf32>
    %cst_49 = arith.constant dense<0xFF800000> : vector<17xf32>
    %84 = vector.multi_reduction <maximumf>, %83, %cst_49 [1] : vector<17x17xf32> to vector<17xf32>
    %85 = vector.shape_cast %84 : vector<17xf32> to vector<17x1xf32>
    %86 = vector.broadcast %85 : vector<17x1xf32> to vector<17x17xf32>
    %87 = arith.subf %83, %86 : vector<17x17xf32>
    %88 = math.exp %87 : vector<17x17xf32>
    %cst_50 = arith.constant dense<0.000000e+00> : vector<17xf32>
    %89 = vector.multi_reduction <add>, %88, %cst_50 [1] : vector<17x17xf32> to vector<17xf32>
    %90 = vector.shape_cast %89 : vector<17xf32> to vector<17x1xf32>
    %91 = arith.truncf %88 : vector<17x17xf32> to vector<17x17xbf16>
    %cst_51 = arith.constant dense<0.000000e+00> : vector<17x16xf32>
    %92 = tpu.matmul %91, %80, %cst_51 {dimension_numbers = #tpu.dot_dimension_numbers<[1], [0], [0], [1], [0, 0, 1, 1], [], []>} : vector<17x17xbf16>, vector<17x16xbf16>, vector<17x16xf32> -> vector<17x16xf32>
    %93 = tpu.reciprocal %90 {approx = true} : vector<17x1xf32> -> vector<17x1xf32>
    %94 = vector.broadcast %93 : vector<17x1xf32> to vector<17x16xf32>
    %95 = arith.mulf %92, %94 : vector<17x16xf32>
    %96 = arith.truncf %95 : vector<17x16xf32> to vector<17x16xbf16>
    %c0_52 = arith.constant 0 : index
    %c0_53 = arith.constant 0 : index
    %c48_54 = arith.constant 48 : index
    %97 = vector.load %arg2[%c0_52, %c0_53, %c48_54] : memref<1x17x64xbf16, #tpu.memory_space<vmem>>, vector<1x17x16xbf16>
    %98 = vector.shape_cast %97 : vector<1x17x16xbf16> to vector<17x16xbf16>
    %99 = vector.shape_cast %96 : vector<17x16xbf16> to vector<1x17x16xbf16>
    tpu.vector_store %arg2[%c0_52, %c0_53, %c48_54], %99 {strides = array<i32>} : memref<1x17x64xbf16, #tpu.memory_space<vmem>>, vector<1x17x16xbf16>,
    return
  }
  func.func @transform_0(%arg0: i32) -> (i32, i32, i32) {
    %c0_i32 = arith.constant 0 : i32
    %c0_i32_0 = arith.constant 0 : i32
    %c0_i32_1 = arith.constant 0 : i32
    return %arg0, %c0_i32, %c0_i32_0 : i32, i32, i32
  }
  func.func @transform_1(%arg0: i32) -> (i32, i32, i32) {
    %c0_i32 = arith.constant 0 : i32
    %c0_i32_0 = arith.constant 0 : i32
    %c0_i32_1 = arith.constant 0 : i32
    return %arg0, %c0_i32, %c0_i32_0 : i32, i32, i32
  }
}

module attributes {stable_mosaic.version = 11 : i64} {
  func.func @_fused_matmul_kernel(%arg0: i32, %arg1: i32, %arg2: i32, %arg3: memref<34x64xf32, #tpu.memory_space<vmem>>, %arg4: memref<64x192xbf16, #tpu.memory_space<vmem>>, %arg5: memref<1x192xf32, #tpu.memory_space<vmem>>, %arg6: memref<1x64xf32, #tpu.memory_space<vmem>>, %arg7: memref<1x64xf32, #tpu.memory_space<vmem>>, %arg8: memref<34x192xbf16, #tpu.memory_space<vmem>>, %arg9: memref<34x64xbf16, #tpu.memory_space<vmem>>) attributes {dimension_semantics = [#tpu.dimension_semantics<parallel>, #tpu.dimension_semantics<arbitrary>, #tpu.dimension_semantics<arbitrary>], iteration_bounds = array<i64: 1, 1, 1>, scalar_prefetch = 0 : i64, scratch_operands = 1 : i64, tpu.core_type = #tpu.core_type<tc>, window_params = [{transform_indices = @transform_0, window_bounds = array<i64: 34, 64>}, {transform_indices = @transform_1, window_bounds = array<i64: 64, 192>}, {transform_indices = @transform_2, window_bounds = array<i64: 1, 192>}, {pipeline_mode = #tpu.pipeline_mode<synchronous>, transform_indices = @transform_3, window_bounds = array<i64: 1, 64>}, {pipeline_mode = #tpu.pipeline_mode<synchronous>, transform_indices = @transform_4, window_bounds = array<i64: 1, 64>}, {transform_indices = @transform_5, window_bounds = array<i64: 34, 192>}]} {
    %c0_i32 = arith.constant 0 : i32
    %0 = arith.cmpi eq, %arg1, %c0_i32 : i32
    %1 = arith.extui %0 : i1 to i32
    %c0_i32_0 = arith.constant 0 : i32
    %2 = arith.cmpi ne, %1, %c0_i32_0 : i32
    scf.if %2 {
      %c0_8 = arith.constant 0 : index
      %c0_9 = arith.constant 0 : index
      %11 = vector.load %arg3[%c0_8, %c0_9] : memref<34x64xf32, #tpu.memory_space<vmem>>, vector<34x64xf32>
      %cst_10 = arith.constant dense<0.000000e+00> : vector<34xf32>
      %12 = vector.multi_reduction <add>, %11, %cst_10 [1] : vector<34x64xf32> to vector<34xf32>
      %13 = vector.shape_cast %12 : vector<34xf32> to vector<34x1xf32>
      %cst_11 = arith.constant 6.400000e+01 : f32
      %14 = vector.broadcast %cst_11 : f32 to vector<34x1xf32>
      %15 = arith.divf %13, %14 : vector<34x1xf32>
      %16 = vector.broadcast %15 : vector<34x1xf32> to vector<34x64xf32>
      %17 = arith.subf %11, %16 : vector<34x64xf32>
      %18 = arith.mulf %17, %17 : vector<34x64xf32>
      %cst_12 = arith.constant dense<0.000000e+00> : vector<34xf32>
      %19 = vector.multi_reduction <add>, %18, %cst_12 [1] : vector<34x64xf32> to vector<34xf32>
      %20 = vector.shape_cast %19 : vector<34xf32> to vector<34x1xf32>
      %cst_13 = arith.constant 6.400000e+01 : f32
      %21 = vector.broadcast %cst_13 : f32 to vector<34x1xf32>
      %22 = arith.divf %20, %21 : vector<34x1xf32>
      %23 = vector.broadcast %15 : vector<34x1xf32> to vector<34x64xf32>
      %24 = arith.subf %11, %23 : vector<34x64xf32>
      %cst_14 = arith.constant 9.99999974E-6 : f32
      %25 = vector.broadcast %cst_14 : f32 to vector<34x1xf32>
      %26 = arith.addf %22, %25 : vector<34x1xf32>
      %27 = math.rsqrt %26 : vector<34x1xf32>
      %28 = vector.broadcast %27 : vector<34x1xf32> to vector<34x64xf32>
      %29 = arith.mulf %24, %28 : vector<34x64xf32>
      %c0_15 = arith.constant 0 : index
      %c0_16 = arith.constant 0 : index
      %30 = vector.load %arg6[%c0_15, %c0_16] : memref<1x64xf32, #tpu.memory_space<vmem>>, vector<1x64xf32>
      %31 = vector.broadcast %30 : vector<1x64xf32> to vector<34x64xf32>
      %32 = arith.mulf %29, %31 : vector<34x64xf32>
      %c0_17 = arith.constant 0 : index
      %c0_18 = arith.constant 0 : index
      %33 = vector.load %arg7[%c0_17, %c0_18] : memref<1x64xf32, #tpu.memory_space<vmem>>, vector<1x64xf32>
      %34 = vector.broadcast %33 : vector<1x64xf32> to vector<34x64xf32>
      %35 = arith.addf %32, %34 : vector<34x64xf32>
      %36 = arith.truncf %35 : vector<34x64xf32> to vector<34x64xbf16>
      %c0_19 = arith.constant 0 : index
      %c0_20 = arith.constant 0 : index
      %37 = vector.load %arg9[%c0_19, %c0_20] : memref<34x64xbf16, #tpu.memory_space<vmem>>, vector<34x64xbf16>
      tpu.vector_store %arg9[%c0_19, %c0_20], %36 {strides = array<i32>} : memref<34x64xbf16, #tpu.memory_space<vmem>>, vector<34x64xbf16>,
    } else {
    }
    %c0 = arith.constant 0 : index
    %c0_1 = arith.constant 0 : index
    %3 = vector.load %arg9[%c0, %c0_1] : memref<34x64xbf16, #tpu.memory_space<vmem>>, vector<34x64xbf16>
    %c0_2 = arith.constant 0 : index
    %c0_3 = arith.constant 0 : index
    %4 = vector.load %arg4[%c0_2, %c0_3] : memref<64x192xbf16, #tpu.memory_space<vmem>>, vector<64x192xbf16>
    %cst = arith.constant dense<0.000000e+00> : vector<34x192xf32>
    %5 = tpu.matmul %3, %4, %cst {dimension_numbers = #tpu.dot_dimension_numbers<[1], [0], [0], [1], [0, 0, 1, 1], [], []>} : vector<34x64xbf16>, vector<64x192xbf16>, vector<34x192xf32> -> vector<34x192xf32>
    %c0_4 = arith.constant 0 : index
    %c0_5 = arith.constant 0 : index
    %6 = vector.load %arg5[%c0_4, %c0_5] : memref<1x192xf32, #tpu.memory_space<vmem>>, vector<1x192xf32>
    %7 = vector.broadcast %6 : vector<1x192xf32> to vector<34x192xf32>
    %8 = arith.addf %5, %7 : vector<34x192xf32>
    %9 = arith.truncf %8 : vector<34x192xf32> to vector<34x192xbf16>
    %c0_6 = arith.constant 0 : index
    %c0_7 = arith.constant 0 : index
    %10 = vector.load %arg8[%c0_6, %c0_7] : memref<34x192xbf16, #tpu.memory_space<vmem>>, vector<34x192xbf16>
    tpu.vector_store %arg8[%c0_6, %c0_7], %9 {strides = array<i32>} : memref<34x192xbf16, #tpu.memory_space<vmem>>, vector<34x192xbf16>,
    return
  }
  func.func @transform_0(%arg0: i32, %arg1: i32, %arg2: i32) -> (i32, i32) {
    %c0_i32 = arith.constant 0 : i32
    return %arg0, %arg2 : i32, i32
  }
  func.func @transform_1(%arg0: i32, %arg1: i32, %arg2: i32) -> (i32, i32) {
    %c0_i32 = arith.constant 0 : i32
    return %arg2, %arg1 : i32, i32
  }
  func.func @transform_2(%arg0: i32, %arg1: i32, %arg2: i32) -> (i32, i32) {
    %c0_i32 = arith.constant 0 : i32
    %c0_i32_0 = arith.constant 0 : i32
    return %c0_i32, %arg1 : i32, i32
  }
  func.func @transform_3(%arg0: i32, %arg1: i32, %arg2: i32) -> (i32, i32) {
    %c0_i32 = arith.constant 0 : i32
    %c0_i32_0 = arith.constant 0 : i32
    %c0_i32_1 = arith.constant 0 : i32
    return %c0_i32, %c0_i32_0 : i32, i32
  }
  func.func @transform_4(%arg0: i32, %arg1: i32, %arg2: i32) -> (i32, i32) {
    %c0_i32 = arith.constant 0 : i32
    %c0_i32_0 = arith.constant 0 : i32
    %c0_i32_1 = arith.constant 0 : i32
    return %c0_i32, %c0_i32_0 : i32, i32
  }
  func.func @transform_5(%arg0: i32, %arg1: i32, %arg2: i32) -> (i32, i32) {
    %c0_i32 = arith.constant 0 : i32
    return %arg0, %arg1 : i32, i32
  }
}

module attributes {stable_mosaic.version = 11 : i64} {
  func.func @_fused_matmul_kernel(%arg0: i32, %arg1: i32, %arg2: i32, %arg3: memref<34x64xbf16, #tpu.memory_space<vmem>>, %arg4: memref<64x64xbf16, #tpu.memory_space<vmem>>, %arg5: memref<1x64xf32, #tpu.memory_space<vmem>>, %arg6: memref<34x64xf32, #tpu.memory_space<vmem>>, %arg7: memref<34x64xf32, #tpu.memory_space<vmem>>) attributes {dimension_semantics = [#tpu.dimension_semantics<parallel>, #tpu.dimension_semantics<parallel>, #tpu.dimension_semantics<arbitrary>], iteration_bounds = array<i64: 1, 1, 1>, scalar_prefetch = 0 : i64, scratch_operands = 0 : i64, tpu.core_type = #tpu.core_type<tc>, window_params = [{transform_indices = @transform_0, window_bounds = array<i64: 34, 64>}, {transform_indices = @transform_1, window_bounds = array<i64: 64, 64>}, {transform_indices = @transform_2, window_bounds = array<i64: 1, 64>}, {transform_indices = @transform_3, window_bounds = array<i64: 34, 64>}, {transform_indices = @transform_4, window_bounds = array<i64: 34, 64>}]} {
    %c0 = arith.constant 0 : index
    %c0_0 = arith.constant 0 : index
    %0 = vector.load %arg3[%c0, %c0_0] : memref<34x64xbf16, #tpu.memory_space<vmem>>, vector<34x64xbf16>
    %c0_1 = arith.constant 0 : index
    %c0_2 = arith.constant 0 : index
    %1 = vector.load %arg4[%c0_1, %c0_2] : memref<64x64xbf16, #tpu.memory_space<vmem>>, vector<64x64xbf16>
    %cst = arith.constant dense<0.000000e+00> : vector<34x64xf32>
    %2 = tpu.matmul %0, %1, %cst {dimension_numbers = #tpu.dot_dimension_numbers<[1], [0], [0], [1], [0, 0, 1, 1], [], []>} : vector<34x64xbf16>, vector<64x64xbf16>, vector<34x64xf32> -> vector<34x64xf32>
    %c0_3 = arith.constant 0 : index
    %c0_4 = arith.constant 0 : index
    %3 = vector.load %arg5[%c0_3, %c0_4] : memref<1x64xf32, #tpu.memory_space<vmem>>, vector<1x64xf32>
    %4 = vector.broadcast %3 : vector<1x64xf32> to vector<34x64xf32>
    %5 = arith.addf %2, %4 : vector<34x64xf32>
    %c0_5 = arith.constant 0 : index
    %c0_6 = arith.constant 0 : index
    %6 = vector.load %arg6[%c0_5, %c0_6] : memref<34x64xf32, #tpu.memory_space<vmem>>, vector<34x64xf32>
    %7 = arith.addf %5, %6 : vector<34x64xf32>
    %c0_7 = arith.constant 0 : index
    %c0_8 = arith.constant 0 : index
    %8 = vector.load %arg7[%c0_7, %c0_8] : memref<34x64xf32, #tpu.memory_space<vmem>>, vector<34x64xf32>
    tpu.vector_store %arg7[%c0_7, %c0_8], %7 {strides = array<i32>} : memref<34x64xf32, #tpu.memory_space<vmem>>, vector<34x64xf32>,
    return
  }
  func.func @transform_0(%arg0: i32, %arg1: i32, %arg2: i32) -> (i32, i32) {
    %c0_i32 = arith.constant 0 : i32
    return %arg0, %arg2 : i32, i32
  }
  func.func @transform_1(%arg0: i32, %arg1: i32, %arg2: i32) -> (i32, i32) {
    %c0_i32 = arith.constant 0 : i32
    return %arg2, %arg1 : i32, i32
  }
  func.func @transform_2(%arg0: i32, %arg1: i32, %arg2: i32) -> (i32, i32) {
    %c0_i32 = arith.constant 0 : i32
    %c0_i32_0 = arith.constant 0 : i32
    return %c0_i32, %arg1 : i32, i32
  }
  func.func @transform_3(%arg0: i32, %arg1: i32, %arg2: i32) -> (i32, i32) {
    %c0_i32 = arith.constant 0 : i32
    return %arg0, %arg1 : i32, i32
  }
  func.func @transform_4(%arg0: i32, %arg1: i32, %arg2: i32) -> (i32, i32) {
    %c0_i32 = arith.constant 0 : i32
    return %arg0, %arg1 : i32, i32
  }
}

module attributes {stable_mosaic.version = 11 : i64} {
  func.func @_fused_matmul_kernel(%arg0: i32, %arg1: i32, %arg2: i32, %arg3: memref<34x64xf32, #tpu.memory_space<vmem>>, %arg4: memref<64x256xbf16, #tpu.memory_space<vmem>>, %arg5: memref<1x256xf32, #tpu.memory_space<vmem>>, %arg6: memref<1x64xf32, #tpu.memory_space<vmem>>, %arg7: memref<1x64xf32, #tpu.memory_space<vmem>>, %arg8: memref<34x256xbf16, #tpu.memory_space<vmem>>, %arg9: memref<34x64xbf16, #tpu.memory_space<vmem>>) attributes {dimension_semantics = [#tpu.dimension_semantics<parallel>, #tpu.dimension_semantics<arbitrary>, #tpu.dimension_semantics<arbitrary>], iteration_bounds = array<i64: 1, 1, 1>, scalar_prefetch = 0 : i64, scratch_operands = 1 : i64, tpu.core_type = #tpu.core_type<tc>, window_params = [{transform_indices = @transform_0, window_bounds = array<i64: 34, 64>}, {transform_indices = @transform_1, window_bounds = array<i64: 64, 256>}, {transform_indices = @transform_2, window_bounds = array<i64: 1, 256>}, {pipeline_mode = #tpu.pipeline_mode<synchronous>, transform_indices = @transform_3, window_bounds = array<i64: 1, 64>}, {pipeline_mode = #tpu.pipeline_mode<synchronous>, transform_indices = @transform_4, window_bounds = array<i64: 1, 64>}, {transform_indices = @transform_5, window_bounds = array<i64: 34, 256>}]} {
    %c0_i32 = arith.constant 0 : i32
    %0 = arith.cmpi eq, %arg1, %c0_i32 : i32
    %1 = arith.extui %0 : i1 to i32
    %c0_i32_0 = arith.constant 0 : i32
    %2 = arith.cmpi ne, %1, %c0_i32_0 : i32
    scf.if %2 {
      %c0_11 = arith.constant 0 : index
      %c0_12 = arith.constant 0 : index
      %19 = vector.load %arg3[%c0_11, %c0_12] : memref<34x64xf32, #tpu.memory_space<vmem>>, vector<34x64xf32>
      %cst_13 = arith.constant dense<0.000000e+00> : vector<34xf32>
      %20 = vector.multi_reduction <add>, %19, %cst_13 [1] : vector<34x64xf32> to vector<34xf32>
      %21 = vector.shape_cast %20 : vector<34xf32> to vector<34x1xf32>
      %cst_14 = arith.constant 6.400000e+01 : f32
      %22 = vector.broadcast %cst_14 : f32 to vector<34x1xf32>
      %23 = arith.divf %21, %22 : vector<34x1xf32>
      %24 = vector.broadcast %23 : vector<34x1xf32> to vector<34x64xf32>
      %25 = arith.subf %19, %24 : vector<34x64xf32>
      %26 = arith.mulf %25, %25 : vector<34x64xf32>
      %cst_15 = arith.constant dense<0.000000e+00> : vector<34xf32>
      %27 = vector.multi_reduction <add>, %26, %cst_15 [1] : vector<34x64xf32> to vector<34xf32>
      %28 = vector.shape_cast %27 : vector<34xf32> to vector<34x1xf32>
      %cst_16 = arith.constant 6.400000e+01 : f32
      %29 = vector.broadcast %cst_16 : f32 to vector<34x1xf32>
      %30 = arith.divf %28, %29 : vector<34x1xf32>
      %31 = vector.broadcast %23 : vector<34x1xf32> to vector<34x64xf32>
      %32 = arith.subf %19, %31 : vector<34x64xf32>
      %cst_17 = arith.constant 9.99999974E-6 : f32
      %33 = vector.broadcast %cst_17 : f32 to vector<34x1xf32>
      %34 = arith.addf %30, %33 : vector<34x1xf32>
      %35 = math.rsqrt %34 : vector<34x1xf32>
      %36 = vector.broadcast %35 : vector<34x1xf32> to vector<34x64xf32>
      %37 = arith.mulf %32, %36 : vector<34x64xf32>
      %c0_18 = arith.constant 0 : index
      %c0_19 = arith.constant 0 : index
      %38 = vector.load %arg6[%c0_18, %c0_19] : memref<1x64xf32, #tpu.memory_space<vmem>>, vector<1x64xf32>
      %39 = vector.broadcast %38 : vector<1x64xf32> to vector<34x64xf32>
      %40 = arith.mulf %37, %39 : vector<34x64xf32>
      %c0_20 = arith.constant 0 : index
      %c0_21 = arith.constant 0 : index
      %41 = vector.load %arg7[%c0_20, %c0_21] : memref<1x64xf32, #tpu.memory_space<vmem>>, vector<1x64xf32>
      %42 = vector.broadcast %41 : vector<1x64xf32> to vector<34x64xf32>
      %43 = arith.addf %40, %42 : vector<34x64xf32>
      %44 = arith.truncf %43 : vector<34x64xf32> to vector<34x64xbf16>
      %c0_22 = arith.constant 0 : index
      %c0_23 = arith.constant 0 : index
      %45 = vector.load %arg9[%c0_22, %c0_23] : memref<34x64xbf16, #tpu.memory_space<vmem>>, vector<34x64xbf16>
      tpu.vector_store %arg9[%c0_22, %c0_23], %44 {strides = array<i32>} : memref<34x64xbf16, #tpu.memory_space<vmem>>, vector<34x64xbf16>,
    } else {
    }
    %c0 = arith.constant 0 : index
    %c0_1 = arith.constant 0 : index
    %3 = vector.load %arg9[%c0, %c0_1] : memref<34x64xbf16, #tpu.memory_space<vmem>>, vector<34x64xbf16>
    %c0_2 = arith.constant 0 : index
    %c0_3 = arith.constant 0 : index
    %4 = vector.load %arg4[%c0_2, %c0_3] : memref<64x256xbf16, #tpu.memory_space<vmem>>, vector<64x256xbf16>
    %cst = arith.constant dense<0.000000e+00> : vector<34x256xf32>
    %5 = tpu.matmul %3, %4, %cst {dimension_numbers = #tpu.dot_dimension_numbers<[1], [0], [0], [1], [0, 0, 1, 1], [], []>} : vector<34x64xbf16>, vector<64x256xbf16>, vector<34x256xf32> -> vector<34x256xf32>
    %c0_4 = arith.constant 0 : index
    %c0_5 = arith.constant 0 : index
    %6 = vector.load %arg5[%c0_4, %c0_5] : memref<1x256xf32, #tpu.memory_space<vmem>>, vector<1x256xf32>
    %7 = vector.broadcast %6 : vector<1x256xf32> to vector<34x256xf32>
    %8 = arith.addf %5, %7 : vector<34x256xf32>
    %cst_6 = arith.constant 5.000000e-01 : f32
    %9 = vector.broadcast %cst_6 : f32 to vector<34x256xf32>
    %10 = arith.mulf %9, %8 : vector<34x256xf32>
    %cst_7 = arith.constant 0.707106769 : f32
    %11 = vector.broadcast %cst_7 : f32 to vector<34x256xf32>
    %12 = arith.mulf %8, %11 : vector<34x256xf32>
    %13 = math.erf %12 : vector<34x256xf32>
    %cst_8 = arith.constant 1.000000e+00 : f32
    %14 = vector.broadcast %cst_8 : f32 to vector<34x256xf32>
    %15 = arith.addf %14, %13 : vector<34x256xf32>
    %16 = arith.mulf %10, %15 : vector<34x256xf32>
    %17 = arith.truncf %16 : vector<34x256xf32> to vector<34x256xbf16>
    %c0_9 = arith.constant 0 : index
    %c0_10 = arith.constant 0 : index
    %18 = vector.load %arg8[%c0_9, %c0_10] : memref<34x256xbf16, #tpu.memory_space<vmem>>, vector<34x256xbf16>
    tpu.vector_store %arg8[%c0_9, %c0_10], %17 {strides = array<i32>} : memref<34x256xbf16, #tpu.memory_space<vmem>>, vector<34x256xbf16>,
    return
  }
  func.func @transform_0(%arg0: i32, %arg1: i32, %arg2: i32) -> (i32, i32) {
    %c0_i32 = arith.constant 0 : i32
    return %arg0, %arg2 : i32, i32
  }
  func.func @transform_1(%arg0: i32, %arg1: i32, %arg2: i32) -> (i32, i32) {
    %c0_i32 = arith.constant 0 : i32
    return %arg2, %arg1 : i32, i32
  }
  func.func @transform_2(%arg0: i32, %arg1: i32, %arg2: i32) -> (i32, i32) {
    %c0_i32 = arith.constant 0 : i32
    %c0_i32_0 = arith.constant 0 : i32
    return %c0_i32, %arg1 : i32, i32
  }
  func.func @transform_3(%arg0: i32, %arg1: i32, %arg2: i32) -> (i32, i32) {
    %c0_i32 = arith.constant 0 : i32
    %c0_i32_0 = arith.constant 0 : i32
    %c0_i32_1 = arith.constant 0 : i32
    return %c0_i32, %c0_i32_0 : i32, i32
  }
  func.func @transform_4(%arg0: i32, %arg1: i32, %arg2: i32) -> (i32, i32) {
    %c0_i32 = arith.constant 0 : i32
    %c0_i32_0 = arith.constant 0 : i32
    %c0_i32_1 = arith.constant 0 : i32
    return %c0_i32, %c0_i32_0 : i32, i32
  }
  func.func @transform_5(%arg0: i32, %arg1: i32, %arg2: i32) -> (i32, i32) {
    %c0_i32 = arith.constant 0 : i32
    return %arg0, %arg1 : i32, i32
  }
}

module attributes {stable_mosaic.version = 11 : i64} {
  func.func @_fused_matmul_kernel(%arg0: i32, %arg1: i32, %arg2: i32, %arg3: memref<34x256xbf16, #tpu.memory_space<vmem>>, %arg4: memref<256x64xbf16, #tpu.memory_space<vmem>>, %arg5: memref<1x64xf32, #tpu.memory_space<vmem>>, %arg6: memref<34x64xf32, #tpu.memory_space<vmem>>, %arg7: memref<34x64xf32, #tpu.memory_space<vmem>>) attributes {dimension_semantics = [#tpu.dimension_semantics<parallel>, #tpu.dimension_semantics<parallel>, #tpu.dimension_semantics<arbitrary>], iteration_bounds = array<i64: 1, 1, 1>, scalar_prefetch = 0 : i64, scratch_operands = 0 : i64, tpu.core_type = #tpu.core_type<tc>, window_params = [{transform_indices = @transform_0, window_bounds = array<i64: 34, 256>}, {transform_indices = @transform_1, window_bounds = array<i64: 256, 64>}, {transform_indices = @transform_2, window_bounds = array<i64: 1, 64>}, {transform_indices = @transform_3, window_bounds = array<i64: 34, 64>}, {transform_indices = @transform_4, window_bounds = array<i64: 34, 64>}]} {
    %c0 = arith.constant 0 : index
    %c0_0 = arith.constant 0 : index
    %0 = vector.load %arg3[%c0, %c0_0] : memref<34x256xbf16, #tpu.memory_space<vmem>>, vector<34x256xbf16>
    %c0_1 = arith.constant 0 : index
    %c0_2 = arith.constant 0 : index
    %1 = vector.load %arg4[%c0_1, %c0_2] : memref<256x64xbf16, #tpu.memory_space<vmem>>, vector<256x64xbf16>
    %cst = arith.constant dense<0.000000e+00> : vector<34x64xf32>
    %2 = tpu.matmul %0, %1, %cst {dimension_numbers = #tpu.dot_dimension_numbers<[1], [0], [0], [1], [0, 0, 1, 1], [], []>} : vector<34x256xbf16>, vector<256x64xbf16>, vector<34x64xf32> -> vector<34x64xf32>
    %c0_3 = arith.constant 0 : index
    %c0_4 = arith.constant 0 : index
    %3 = vector.load %arg5[%c0_3, %c0_4] : memref<1x64xf32, #tpu.memory_space<vmem>>, vector<1x64xf32>
    %4 = vector.broadcast %3 : vector<1x64xf32> to vector<34x64xf32>
    %5 = arith.addf %2, %4 : vector<34x64xf32>
    %c0_5 = arith.constant 0 : index
    %c0_6 = arith.constant 0 : index
    %6 = vector.load %arg6[%c0_5, %c0_6] : memref<34x64xf32, #tpu.memory_space<vmem>>, vector<34x64xf32>
    %7 = arith.addf %5, %6 : vector<34x64xf32>
    %c0_7 = arith.constant 0 : index
    %c0_8 = arith.constant 0 : index
    %8 = vector.load %arg7[%c0_7, %c0_8] : memref<34x64xf32, #tpu.memory_space<vmem>>, vector<34x64xf32>
    tpu.vector_store %arg7[%c0_7, %c0_8], %7 {strides = array<i32>} : memref<34x64xf32, #tpu.memory_space<vmem>>, vector<34x64xf32>,
    return
  }
  func.func @transform_0(%arg0: i32, %arg1: i32, %arg2: i32) -> (i32, i32) {
    %c0_i32 = arith.constant 0 : i32
    return %arg0, %arg2 : i32, i32
  }
  func.func @transform_1(%arg0: i32, %arg1: i32, %arg2: i32) -> (i32, i32) {
    %c0_i32 = arith.constant 0 : i32
    return %arg2, %arg1 : i32, i32
  }
  func.func @transform_2(%arg0: i32, %arg1: i32, %arg2: i32) -> (i32, i32) {
    %c0_i32 = arith.constant 0 : i32
    %c0_i32_0 = arith.constant 0 : i32
    return %c0_i32, %arg1 : i32, i32
  }
  func.func @transform_3(%arg0: i32, %arg1: i32, %arg2: i32) -> (i32, i32) {
    %c0_i32 = arith.constant 0 : i32
    return %arg0, %arg1 : i32, i32
  }
  func.func @transform_4(%arg0: i32, %arg1: i32, %arg2: i32) -> (i32, i32) {
    %c0_i32 = arith.constant 0 : i32
    return %arg0, %arg1 : i32, i32
  }
}

module attributes {stable_mosaic.version = 11 : i64} {
  func.func @_fused_matmul_kernel(%arg0: i32, %arg1: i32, %arg2: i32, %arg3: memref<2x64xf32, #tpu.memory_space<vmem>>, %arg4: memref<64x10xbf16, #tpu.memory_space<vmem>>, %arg5: memref<1x10xf32, #tpu.memory_space<vmem>>, %arg6: memref<1x64xf32, #tpu.memory_space<vmem>>, %arg7: memref<1x64xf32, #tpu.memory_space<vmem>>, %arg8: memref<2x10xf32, #tpu.memory_space<vmem>>, %arg9: memref<2x64xbf16, #tpu.memory_space<vmem>>) attributes {dimension_semantics = [#tpu.dimension_semantics<parallel>, #tpu.dimension_semantics<arbitrary>, #tpu.dimension_semantics<arbitrary>], iteration_bounds = array<i64: 1, 1, 1>, scalar_prefetch = 0 : i64, scratch_operands = 1 : i64, tpu.core_type = #tpu.core_type<tc>, window_params = [{transform_indices = @transform_0, window_bounds = array<i64: 2, 64>}, {transform_indices = @transform_1, window_bounds = array<i64: 64, 10>}, {transform_indices = @transform_2, window_bounds = array<i64: 1, 10>}, {pipeline_mode = #tpu.pipeline_mode<synchronous>, transform_indices = @transform_3, window_bounds = array<i64: 1, 64>}, {pipeline_mode = #tpu.pipeline_mode<synchronous>, transform_indices = @transform_4, window_bounds = array<i64: 1, 64>}, {transform_indices = @transform_5, window_bounds = array<i64: 2, 10>}]} {
    %c0_i32 = arith.constant 0 : i32
    %0 = arith.cmpi eq, %arg1, %c0_i32 : i32
    %1 = arith.extui %0 : i1 to i32
    %c0_i32_0 = arith.constant 0 : i32
    %2 = arith.cmpi ne, %1, %c0_i32_0 : i32
    scf.if %2 {
      %c0_8 = arith.constant 0 : index
      %c0_9 = arith.constant 0 : index
      %10 = vector.load %arg3[%c0_8, %c0_9] : memref<2x64xf32, #tpu.memory_space<vmem>>, vector<2x64xf32>
      %cst_10 = arith.constant dense<0.000000e+00> : vector<2xf32>
      %11 = vector.multi_reduction <add>, %10, %cst_10 [1] : vector<2x64xf32> to vector<2xf32>
      %12 = vector.shape_cast %11 : vector<2xf32> to vector<2x1xf32>
      %cst_11 = arith.constant 6.400000e+01 : f32
      %13 = vector.broadcast %cst_11 : f32 to vector<2x1xf32>
      %14 = arith.divf %12, %13 : vector<2x1xf32>
      %15 = vector.broadcast %14 : vector<2x1xf32> to vector<2x64xf32>
      %16 = arith.subf %10, %15 : vector<2x64xf32>
      %17 = arith.mulf %16, %16 : vector<2x64xf32>
      %cst_12 = arith.constant dense<0.000000e+00> : vector<2xf32>
      %18 = vector.multi_reduction <add>, %17, %cst_12 [1] : vector<2x64xf32> to vector<2xf32>
      %19 = vector.shape_cast %18 : vector<2xf32> to vector<2x1xf32>
      %cst_13 = arith.constant 6.400000e+01 : f32
      %20 = vector.broadcast %cst_13 : f32 to vector<2x1xf32>
      %21 = arith.divf %19, %20 : vector<2x1xf32>
      %22 = vector.broadcast %14 : vector<2x1xf32> to vector<2x64xf32>
      %23 = arith.subf %10, %22 : vector<2x64xf32>
      %cst_14 = arith.constant 9.99999974E-6 : f32
      %24 = vector.broadcast %cst_14 : f32 to vector<2x1xf32>
      %25 = arith.addf %21, %24 : vector<2x1xf32>
      %26 = math.rsqrt %25 : vector<2x1xf32>
      %27 = vector.broadcast %26 : vector<2x1xf32> to vector<2x64xf32>
      %28 = arith.mulf %23, %27 : vector<2x64xf32>
      %c0_15 = arith.constant 0 : index
      %c0_16 = arith.constant 0 : index
      %29 = vector.load %arg6[%c0_15, %c0_16] : memref<1x64xf32, #tpu.memory_space<vmem>>, vector<1x64xf32>
      %30 = vector.broadcast %29 : vector<1x64xf32> to vector<2x64xf32>
      %31 = arith.mulf %28, %30 : vector<2x64xf32>
      %c0_17 = arith.constant 0 : index
      %c0_18 = arith.constant 0 : index
      %32 = vector.load %arg7[%c0_17, %c0_18] : memref<1x64xf32, #tpu.memory_space<vmem>>, vector<1x64xf32>
      %33 = vector.broadcast %32 : vector<1x64xf32> to vector<2x64xf32>
      %34 = arith.addf %31, %33 : vector<2x64xf32>
      %35 = arith.truncf %34 : vector<2x64xf32> to vector<2x64xbf16>
      %c0_19 = arith.constant 0 : index
      %c0_20 = arith.constant 0 : index
      %36 = vector.load %arg9[%c0_19, %c0_20] : memref<2x64xbf16, #tpu.memory_space<vmem>>, vector<2x64xbf16>
      tpu.vector_store %arg9[%c0_19, %c0_20], %35 {strides = array<i32>} : memref<2x64xbf16, #tpu.memory_space<vmem>>, vector<2x64xbf16>,
    } else {
    }
    %c0 = arith.constant 0 : index
    %c0_1 = arith.constant 0 : index
    %3 = vector.load %arg9[%c0, %c0_1] : memref<2x64xbf16, #tpu.memory_space<vmem>>, vector<2x64xbf16>
    %c0_2 = arith.constant 0 : index
    %c0_3 = arith.constant 0 : index
    %4 = vector.load %arg4[%c0_2, %c0_3] : memref<64x10xbf16, #tpu.memory_space<vmem>>, vector<64x10xbf16>
    %cst = arith.constant dense<0.000000e+00> : vector<2x10xf32>
    %5 = tpu.matmul %3, %4, %cst {dimension_numbers = #tpu.dot_dimension_numbers<[1], [0], [0], [1], [0, 0, 1, 1], [], []>} : vector<2x64xbf16>, vector<64x10xbf16>, vector<2x10xf32> -> vector<2x10xf32>
    %c0_4 = arith.constant 0 : index
    %c0_5 = arith.constant 0 : index
    %6 = vector.load %arg5[%c0_4, %c0_5] : memref<1x10xf32, #tpu.memory_space<vmem>>, vector<1x10xf32>
    %7 = vector.broadcast %6 : vector<1x10xf32> to vector<2x10xf32>
    %8 = arith.addf %5, %7 : vector<2x10xf32>
    %c0_6 = arith.constant 0 : index
    %c0_7 = arith.constant 0 : index
    %9 = vector.load %arg8[%c0_6, %c0_7] : memref<2x10xf32, #tpu.memory_space<vmem>>, vector<2x10xf32>
    tpu.vector_store %arg8[%c0_6, %c0_7], %8 {strides = array<i32>} : memref<2x10xf32, #tpu.memory_space<vmem>>, vector<2x10xf32>,
    return
  }
  func.func @transform_0(%arg0: i32, %arg1: i32, %arg2: i32) -> (i32, i32) {
    %c0_i32 = arith.constant 0 : i32
    return %arg0, %arg2 : i32, i32
  }
  func.func @transform_1(%arg0: i32, %arg1: i32, %arg2: i32) -> (i32, i32) {
    %c0_i32 = arith.constant 0 : i32
    return %arg2, %arg1 : i32, i32
  }
  func.func @transform_2(%arg0: i32, %arg1: i32, %arg2: i32) -> (i32, i32) {
    %c0_i32 = arith.constant 0 : i32
    %c0_i32_0 = arith.constant 0 : i32
    return %c0_i32, %arg1 : i32, i32
  }
  func.func @transform_3(%arg0: i32, %arg1: i32, %arg2: i32) -> (i32, i32) {
    %c0_i32 = arith.constant 0 : i32
    %c0_i32_0 = arith.constant 0 : i32
    %c0_i32_1 = arith.constant 0 : i32
    return %c0_i32, %c0_i32_0 : i32, i32
  }
  func.func @transform_4(%arg0: i32, %arg1: i32, %arg2: i32) -> (i32, i32) {
    %c0_i32 = arith.constant 0 : i32
    %c0_i32_0 = arith.constant 0 : i32
    %c0_i32_1 = arith.constant 0 : i32
    return %c0_i32, %c0_i32_0 : i32, i32
  }
  func.func @transform_5(%arg0: i32, %arg1: i32, %arg2: i32) -> (i32, i32) {
    %c0_i32 = arith.constant 0 : i32
    return %arg0, %arg1 : i32, i32
  }
}

</mosaic_0001>

<bundles_post_ra>
// kernel: vit_forward.12
= control target key start
LH: loop header
LB: loop body
LE: loop exit
PB: predicated region body
PF: predicated region fallthrough
CT: control target
= control target key end

     0   :  { %v246_v0 = vmov 0   ;;  %vm130_vm0 = vcmask 523264   ;;  %s372_s1 = inlined_call_operand.vmem [shape: bf16[192,64], index: 1, kind: input, shape index: {}]   ;;  %s373_s0 = inlined_call_operand.vmem [shape: f32[32,192], index: 0, kind: input, shape index: {}]   ;;  %s374_s2 = inlined_call_operand.vmem [shape: f32[1,64], index: 2, kind: input, shape index: {}]   ;;  %s375_s3 = inlined_call_operand.vmem [shape: f32[32,64], index: 3, kind: output, shape index: {}]  }
   0x1   :  { %137 = vmatprep.subr.bf16.mxu0 %v246_v0  ;;  %209 = vmatprep.subr.bf16.mxu1 %v246_v0  ;;  %v234_v1 = vld [vmem:[%s372_s1] sm:$0xff]   ;;  %v235_v2 = vld [vmem:[%s372_s1 + $0x8] sm:$0xff]   ;;  %v236_v3 = vld [vmem:[%s372_s1 + $0x10] sm:$0xff]  }
   0x2   :  { %138 = vmatpush1.bf16.msra.mxu0 %v234_v1  ;;  %221 = vmatpush1.bf16.msra.mxu1 %v234_v1  ;;  %v237_v4 = vld [vmem:[%s372_s1 + $0x18] sm:$0xff]   ;;  %v16_v5 = vld [vmem:[%s373_s0 + $0x8] sm:$0xff]  ;;  %v238_v10 = vld [vmem:[%s372_s1 + $0x20] sm:$0xff]  }
   0x3   :  { %139 = vmatprep.subr.bf16.mxu0 %v246_v0  ;;  %210 = vmatprep.subr.bf16.mxu1 %v246_v0  ;;  %v18_v6 = vld [vmem:[%s373_s0 + $0x18] sm:$0xff]  ;;  %v20_v7 = vld [vmem:[%s373_s0 + $0x28] sm:$0xff]  ;;  %v240_v13 = vld [vmem:[%s372_s1 + $0x30] sm:$0xff]  }
   0x4   :  { %v24_v8 = vpack.c.bf16 %v18_v6, %v16_v5  ;;  %v22_v9 = vld [vmem:[%s373_s0 + $0x38] sm:$0xff]  ;;  %v239_v12 = vld [vmem:[%s372_s1 + $0x28] sm:$0xff]   ;;  %v242_v15 = vld [vmem:[%s372_s1 + $0x40] sm:$0xff]  }
   0x5   :  { %v26_v11 = vpack.c.bf16 %v22_v9, %v20_v7  ;;  %v241_v14 = vld [vmem:[%s372_s1 + $0x38] sm:$0xff]   ;;  %v243_v16 = vld [vmem:[%s372_s1 + $0x48] sm:$0xff]   ;;  %v244_v17 = vld [vmem:[%s372_s1 + $0x50] sm:$0xff]  }
   0x6   :  { %140 = vmatpush1.bf16.msra.mxu0 %v235_v2  ;;  %222 = vmatpush1.bf16.msra.mxu1 %v235_v2  ;;  %v245_v18 = vld [vmem:[%s372_s1 + $0x58] sm:$0xff]   ;;  %v15_v19 = vld [vmem:[%s373_s0] sm:$0xff]  ;;  %v17_v20 = vld [vmem:[%s373_s0 + $0x10] sm:$0xff] }
   0x7   :  { %141 = vmatprep.subr.bf16.mxu0 %v246_v0  ;;  %211 = vmatprep.subr.bf16.mxu1 %v246_v0  ;;  %v19_v21 = vld [vmem:[%s373_s0 + $0x20] sm:$0xff]  ;;  %v21_v22 = vld [vmem:[%s373_s0 + $0x30] sm:$0xff]  ;;  %v23_v23 = vpack.c.bf16 %v17_v20, %v15_v19 }
   0x8   :  { %207 = vmatprep.mubr.msk.bf16.mxu0 %vm130_vm0, %v24_v8  ;;  %208 = vmatprep.mubr.msk.bf16.mxu1 %vm130_vm0, %v26_v11  ;;  %v25_v24 = vpack.c.bf16 %v21_v22, %v19_v21  ;;  %v194_v25 = vld [vmem:[%s374_s2] ss:$0 sm:$0xff] }
   0xa   :  { %142 = vmatpush1.bf16.msra.mxu0 %v236_v3  ;;  %223 = vmatpush1.bf16.msra.mxu1 %v236_v3 }
   0xb   :  { %143 = vmatprep.subr.bf16.mxu0 %v246_v0  ;;  %212 = vmatprep.subr.bf16.mxu1 %v246_v0 }
   0xe   :  { %144 = vmatpush1.bf16.msra.mxu0 %v237_v4  ;;  %224 = vmatpush1.bf16.msra.mxu1 %v237_v4 }
   0xf   :  { %145 = vmatprep.subr.bf16.mxu0 %v246_v0  ;;  %213 = vmatprep.subr.bf16.mxu1 %v246_v0 }
  0x12   :  { %146 = vmatpush1.bf16.msra.mxu0 %v238_v10  ;;  %225 = vmatpush1.bf16.msra.mxu1 %v238_v10 }
  0x13   :  { %147 = vmatprep.subr.bf16.mxu0 %v246_v0  ;;  %214 = vmatprep.subr.bf16.mxu1 %v246_v0 }
  0x16   :  { %148 = vmatpush1.bf16.msra.mxu0 %v239_v12  ;;  %226 = vmatpush1.bf16.msra.mxu1 %v239_v12 }
  0x17   :  { %149 = vmatprep.subr.bf16.mxu0 %v246_v0  ;;  %215 = vmatprep.subr.bf16.mxu1 %v246_v0 }
  0x1a   :  { %150 = vmatpush1.bf16.msra.mxu0 %v240_v13  ;;  %227 = vmatpush1.bf16.msra.mxu1 %v240_v13 }
  0x1b   :  { %151 = vmatprep.subr.bf16.mxu0 %v246_v0  ;;  %216 = vmatprep.subr.bf16.mxu1 %v246_v0 }
  0x1e   :  { %152 = vmatpush1.bf16.msra.mxu0 %v241_v14  ;;  %228 = vmatpush1.bf16.msra.mxu1 %v241_v14 }
  0x1f   :  { %153 = vmatprep.subr.bf16.mxu0 %v246_v0  ;;  %217 = vmatprep.subr.bf16.mxu1 %v246_v0 }
  0x22   :  { %154 = vmatpush1.bf16.msra.mxu0 %v242_v15  ;;  %229 = vmatpush1.bf16.msra.mxu1 %v242_v15 }
  0x23   :  { %155 = vmatprep.subr.bf16.mxu0 %v246_v0  ;;  %218 = vmatprep.subr.bf16.mxu1 %v246_v0 }
  0x26   :  { %156 = vmatpush1.bf16.msra.mxu0 %v243_v16  ;;  %230 = vmatpush1.bf16.msra.mxu1 %v243_v16 }
  0x27   :  { %157 = vmatprep.subr.bf16.mxu0 %v246_v0  ;;  %219 = vmatprep.subr.bf16.mxu1 %v246_v0 }
  0x2a   :  { %158 = vmatpush1.bf16.msra.mxu0 %v244_v17  ;;  %231 = vmatpush1.bf16.msra.mxu1 %v244_v17 }
  0x2b   :  { %159 = vmatprep.subr.bf16.mxu0 %v246_v0  ;;  %220 = vmatprep.subr.bf16.mxu1 %v246_v0 }
  0x2e   :  { %160 = vmatpush1.bf16.msra.mxu0 %v245_v18  ;;  %232 = vmatpush1.bf16.msra.mxu1 %v245_v18 }
  0x31   :  { %170 = vmatmul.mubr.bf16.vlgmr.msra.gmra.mrb[0].mxu0 %v23_v23  ;;  %178 = vmatmul.mubr.bf16.vlgmr.msra.gmra.mrb[0].mxu1 %v25_v24 }
 0x104   :  { %v171_v26 = vpop.f32.mrb[0].mxu0  ;;  %v179_v27 = vpop.f32.mrb[0].mxu1 }
 0x105   :  { %v172_v28 = vadd.f32 %v194_v25, %v171_v26  ;;  %v180_v29 = vadd.f32 %v194_v25, %v179_v27  ;;  %v173_v30 = vpop.f32.mrb[1].mxu0  ;;  %v181_v31 = vpop.f32.mrb[1].mxu1 }
 0x106   :  { %v174_v32 = vpop.f32.mrb[2].mxu0  ;;  %v182_v33 = vpop.f32.mrb[2].mxu1 }
 0x107   :  { %186 = vst.msk [vmem:[%s375_s3] sm:$0xff] %vm130_vm0, %v172_v28  ;;  %188 = vst.msk [vmem:[%s375_s3 + $0x10] sm:$0xff] %vm130_vm0, %v180_v29  ;;  %v175_v34 = vadd.f32 %v194_v25, %v174_v32  ;;  %v183_v35 = vadd.f32 %v194_v25, %v182_v33  ;;  %v176_v36 = vpop.f32.mrb[3].mxu0  ;;  %v184_v37 = vpop.f32.mrb[3].mxu1 }
 0x109   :  { %187 = vst.msk [vmem:[%s375_s3 + $0x8] sm:$0xff] %vm130_vm0, %v175_v34  ;;  %189 = vst.msk [vmem:[%s375_s3 + $0x18] sm:$0xff] %vm130_vm0, %v183_v35 }

// kernel: vit_forward.13
= control target key start
LH: loop header
LB: loop body
LE: loop exit
PB: predicated region body
PF: predicated region fallthrough
CT: control target
= control target key end

     0   :  { %vm30_vm0 = vcmask 523264   ;;  %vm43_vm1 = vcmask 517120   ;;  %v416_v43 = vmov 0   ;;  %vm143_vm2 = vcmask 519168   ;;  %s567_s0 = inlined_call_operand.vmem [shape: f32[34,64], index: 0, kind: input, shape index: {}]   ;;  %s568_s1 = inlined_call_operand.vmem [shape: bf16[64,192], index: 1, kind: input, shape index: {}]   ;;  %s569_s3 = inlined_call_operand.vmem [shape: f32[1,64], index: 3, kind: input, shape index: {}]   ;;  %s570_s4 = inlined_call_operand.vmem [shape: f32[1,64], index: 4, kind: input, shape index: {}]   ;;  %s571_s2 = inlined_call_operand.vmem [shape: f32[1,192], index: 2, kind: input, shape index: {}]   ;;  %s572_s5 = inlined_call_operand.vmem [shape: bf16[34,192], index: 5, kind: output, shape index: {}]  }
   0x1   :  { %v27_v0 = vld [vmem:[%s567_s0 + $0x10] sm:$0xff]  ;;  %v28_v1 = vld [vmem:[%s567_s0 + $0x18] sm:$0xff]  ;;  %v25_v2 = vld [vmem:[%s567_s0] sm:$0xff]  ;;  %280 = vmatprep.mubr.bf16.mxu1 %v416_v43  ;;  %270 = vmatprep.mubr.bf16.mxu0 %v416_v43  ;;  %vm148_vm3 = vcmask 516096   ;;  %vm331_vm4 = vcmask 1043456   ;;  %vm332_vm5 = vcmask 523268  }
   0x2   :  { %v37_v3 = vsel %vm30_vm0, %v27_v0, 0.0  ;;  %v31_v4 = vsel %vm30_vm0, %v25_v2, 0.0  ;;  %v26_v5 = vld [vmem:[%s567_s0 + $0x8] sm:$0xff]  ;;  %v40_v6 = vsel %vm30_vm0, %v28_v1, 0.0  ;;  %v29_v8 = vld [vmem:[%s567_s0 + $0x20] sm:$0x3]  ;;  %vm540_vm6 = vmor %vm332_vm5, %vm331_vm4 }
   0x3   :  { %38 = vadd.xlane.f32.xlu0 %v37_v3  ;;  %32 = vadd.xlane.f32.xlu1 %v31_v4  ;;  %v34_v7 = vsel %vm30_vm0, %v26_v5, 0.0  ;;  %v44_v9 = vsel %vm43_vm1, %v29_v8, 0.0  ;;  %v391_v35 = vld [vmem:[%s568_s1 + $0x4] ss:$8 sps:$4 sm:$0xff]   ;;  %v393_v36 = vld [vmem:[%s568_s1] ss:$8 sps:$4 sm:$0xff]  }
   0x4   :  { %382 = vmatprep.subr.bf16.mxu1 %v391_v35  ;;  %238 = vmatprep.subr.bf16.mxu0 %v391_v35  ;;  %v394_v37 = vld [vmem:[%s568_s1 + $0x14] ss:$8 sps:$4 sm:$0xff]   ;;  %v396_v38 = vld [vmem:[%s568_s1 + $0x10] ss:$8 sps:$4 sm:$0xff]   ;;  %v397_v39 = vld [vmem:[%s568_s1 + $0x24] ss:$8 sps:$4 sm:$0xff]  }
   0x5   :  { %386 = vmatpush1.bf16.msra.mxu1 %v393_v36  ;;  %239 = vmatpush1.bf16.msra.mxu0 %v393_v36  ;;  %v399_v40 = vld [vmem:[%s568_s1 + $0x20] ss:$8 sps:$4 sm:$0xff]   ;;  %v400_v41 = vld [vmem:[%s568_s1 + $0x34] ss:$8 sps:$4 sm:$0xff]   ;;  %v402_v42 = vld [vmem:[%s568_s1 + $0x30] ss:$8 sps:$4 sm:$0xff]  }
   0x6   :  { %383 = vmatprep.subr.bf16.mxu1 %v394_v37  ;;  %240 = vmatprep.subr.bf16.mxu0 %v394_v37  ;;  %v346_v60 = vld [vmem:[%s569_s3] ss:$0 sm:$0xff]  ;;  %vm338_vm7 = vcmask 1040384   ;;  %vm339_vm8 = vcmask 520196  }
   0x7   :  { %41 = vadd.xlane.f32.xlu0 %v40_v6  ;;  %35 = vadd.xlane.f32.xlu1 %v34_v7  ;;  %v347_v62 = vld [vmem:[%s570_s4] ss:$0 sm:$0xff]  ;;  %vm340_vm9 = vmor %vm339_vm8, %vm338_vm7 }
   0x9   :  { %387 = vmatpush1.bf16.msra.mxu1 %v396_v38  ;;  %241 = vmatpush1.bf16.msra.mxu0 %v396_v38 }
   0xa   :  { %384 = vmatprep.subr.bf16.mxu1 %v397_v39  ;;  %242 = vmatprep.subr.bf16.mxu0 %v397_v39 }
   0xb   :  { %45 = vadd.xlane.f32.xlu0 %v44_v9 }
   0xd   :  { %388 = vmatpush1.bf16.msra.mxu1 %v399_v40  ;;  %243 = vmatpush1.bf16.msra.mxu0 %v399_v40 }
   0xe   :  { %385 = vmatprep.subr.bf16.mxu1 %v400_v41  ;;  %244 = vmatprep.subr.bf16.mxu0 %v400_v41 }
  0x11   :  { %389 = vmatpush1.bf16.msra.mxu1 %v402_v42  ;;  %245 = vmatpush1.bf16.msra.mxu0 %v402_v42 }
  0x90   :  { %v39_v10 = vpop.xlane.xlu0 %38  ;;  %v33_v11 = vpop.xlane.xlu1 %32 }
  0x91   :  { %v50_v12 = vmul.f32 0.015625, %v39_v10  ;;  %v48_v13 = vmul.f32 0.015625, %v33_v11 }
  0x93   :  { %v467_v14 = vsub.f32 %v27_v0, %v50_v12  ;;  %v469_v15 = vsub.f32 %v25_v2, %v48_v13 }
  0x94   :  { %v42_v16 = vpop.xlane.xlu0 %41  ;;  %v36_v17 = vpop.xlane.xlu1 %35 }
  0x95   :  { %v51_v18 = vmul.f32 0.015625, %v42_v16  ;;  %v60_v19 = vmul.f32 %v467_v14, %v467_v14  ;;  %v49_v20 = vmul.f32 0.015625, %v36_v17  ;;  %v58_v21 = vmul.f32 %v469_v15, %v469_v15 }
  0x97   :  { %v475_v22 = vsub.f32 %v28_v1, %v51_v18  ;;  %v69_v23 = vsel %vm30_vm0, %v60_v19, 0.0  ;;  %v478_v24 = vsub.f32 %v26_v5, %v49_v20  ;;  %v63_v28 = vsel %vm30_vm0, %v58_v21, 0.0 }
  0x98   :  { %v46_v25 = vpop.xlane.xlu0 %45  ;;  %70 = vadd.xlane.f32.xlu1 %v69_v23 }
  0x99   :  { %v52_v26 = vmul.f32 0.015625, %v46_v25  ;;  %v61_v27 = vmul.f32 %v475_v22, %v475_v22  ;;  %v59_v29 = vmul.f32 %v478_v24, %v478_v24  ;;  %v165_v25 = vlaneseq }
  0x9b   :  { %v485_v30 = vsub.f32 %v29_v8, %v52_v26  ;;  %v72_v31 = vsel %vm30_vm0, %v61_v27, 0.0  ;;  %v66_v33 = vsel %vm30_vm0, %v59_v29, 0.0  ;;  %v166_v26 = vshrl.u32 %v165_v25, 7 }
  0x9c   :  { %73 = vadd.xlane.f32.xlu0 %v72_v31  ;;  %64 = vadd.xlane.f32.xlu1 %v63_v28  ;;  %v163_v28 = vld [vmem:[%s571_s2] sm:$0x3] }
  0x9d   :  { %v62_v32 = vmul.f32 %v485_v30, %v485_v30  ;;  %v167_v27 = vsub.s32 0, %v166_v26  ;;  %v171_v29 = vsub.s32 1, %v166_v26 }
  0x9f   :  { %v75_v34 = vsel %vm43_vm1, %v62_v32, 0.0  ;;  %v172_v31 = vrot.slane %v163_v28, %v171_v29 }
  0xa0   :  { %76 = vadd.xlane.f32.xlu1 %v75_v34  ;;  %67 = vadd.xlane.f32.xlu0 %v66_v33 }
 0x125   :  { %v71_v44 = vpop.xlane.xlu1 %70 }
 0x126   :  { %v80_v45 = vmul.f32 0.015625, %v71_v44 }
 0x128   :  { %v85_v46 = vadd.f32 1e-05, %v80_v45 }
 0x129   :  { %v74_v47 = vpop.xlane.xlu0 %73  ;;  %v65_v48 = vpop.xlane.xlu1 %64 }
 0x12a   :  { %406 = vrsqrt.f32 %v85_v46  ;;  %v81_v49 = vmul.f32 0.015625, %v74_v47  ;;  %v78_v50 = vmul.f32 0.015625, %v65_v48 }
 0x12c   :  { %v86_v51 = vadd.f32 1e-05, %v81_v49  ;;  %v83_v52 = vadd.f32 1e-05, %v78_v50 }
 0x12d   :  { %v68_v53 = vpop.xlane.xlu0 %67  ;;  %v77_v54 = vpop.xlane.xlu1 %76 }
 0x12e   :  { %408 = vrsqrt.f32 %v86_v51  ;;  %v79_v55 = vmul.f32 0.015625, %v68_v53  ;;  %v82_v56 = vmul.f32 0.015625, %v77_v54 }
 0x12f   :  { %410 = vrsqrt.f32 %v83_v52 }
 0x130   :  { %v84_v57 = vadd.f32 1e-05, %v79_v55  ;;  %v87_v58 = vadd.f32 1e-05, %v82_v56 }
 0x132   :  { %412 = vrsqrt.f32 %v84_v57 }
 0x133   :  { %414 = vrsqrt.f32 %v87_v58 }
 0x134   :  { %v407_v59 = vpop.eup %406 }
 0x135   :  { %v95_v61 = vmul.f32 %v407_v59, %v467_v14 }
 0x137   :  { %v107_v63 = vmul.f32 %v346_v60, %v95_v61 }
 0x138   :  { %v409_v0 = vpop.eup %408 }
 0x139   :  { %v411_v1 = vpop.eup %410  ;;  %v119_v2 = vadd.f32 %v347_v62, %v107_v63  ;;  %v96_v3 = vmul.f32 %v409_v0, %v475_v22 }
 0x13a   :  { %v93_v4 = vmul.f32 %v411_v1, %v469_v15 }
 0x13b   :  { %v374_v5 = vpack.c.bf16 %v119_v2, %v119_v2  ;;  %v108_v6 = vmul.f32 %v346_v60, %v96_v3 }
 0x13c   :  { %v413_v7 = vpop.eup %412  ;;  %v105_v8 = vmul.f32 %v346_v60, %v93_v4 }
 0x13d   :  { %v415_v9 = vpop.eup %414  ;;  %146 = vst.msk [vmem:[#allocation2 + $0x8] sm:$0xf] %vm143_vm2, %v374_v5  ;;  %v120_v10 = vadd.f32 %v347_v62, %v108_v6  ;;  %v94_v11 = vmul.f32 %v413_v7, %v478_v24 }
 0x13e   :  { %v117_v12 = vadd.f32 %v347_v62, %v105_v8  ;;  %v97_v13 = vmul.f32 %v415_v9, %v485_v30  ;;  %v168_v30 = vrot.slane %v163_v28, %v167_v27 }
 0x13f   :  { %v375_v14 = vpack.c.bf16 %v120_v10, %v120_v10  ;;  %v106_v16 = vmul.f32 %v346_v60, %v94_v11 }
 0x140   :  { %v372_v17 = vpack.c.bf16 %v117_v12, %v117_v12  ;;  %v109_v18 = vmul.f32 %v346_v60, %v97_v13 }
 0x141   :  { %147 = vst.msk [vmem:[#allocation2 + $0xc] sm:$0xf] %vm143_vm2, %v375_v14  ;;  %v118_v15 = vadd.f32 %v347_v62, %v106_v16 }
 0x142   :  { %144 = vst.msk [vmem:[#allocation2] sm:$0xf] %vm143_vm2, %v372_v17  ;;  %v121_v19 = vadd.f32 %v347_v62, %v109_v18 }
 0x143   :  { %v373_v20 = vpack.c.bf16 %v118_v15, %v118_v15 }
 0x144   :  { %v376_v21 = vpack.c.bf16 %v121_v19, %v121_v19 }
 0x145   :  { %145 = vst.msk [vmem:[#allocation2 + $0x4] sm:$0xf] %vm143_vm2, %v373_v20 }
 0x146   :  { %149 = vst.msk [vmem:[#allocation2 + $0x10] sm:$0x1] %vm148_vm3, %v376_v21 }
 0x148   :  { %v403_v22 = vld [vmem:[#allocation2 + $0x8] sm:$0xff]  }
 0x149   :  { %365 = vmatmul.mubr.msk.bf16.vlgmr.msra.gmra.mrb[0].mxu1 %vm30_vm0, %v403_v22 }
 0x14a   :  { %290 = vmatprep.mubr.bf16.mxu1 %v416_v43 }
 0x14c   :  { %v404_v23 = vld [vmem:[#allocation2] sm:$0xff]  }
 0x14d   :  { %364 = vmatmul.mubr.msk.bf16.vlgmr.msra.gmra.mrb[0].mxu0 %vm30_vm0, %v404_v23  ;;  %v405_v24 = vld [vmem:[#allocation2 + $0x10] ss:$0 sps:$4 sm:$0x11]  }
 0x151   :  { %366 = vmatmul.mubr.msk.bf16.gmra.mrb[4].mxu1 %vm30_vm0, %v405_v24 }
 0x21c   :  { %v282_v32 = vpop.f32.mrb[0].mxu1 }
 0x21d   :  { %v283_v33 = vadd.f32 %v282_v32, %v168_v30  ;;  %v284_v34 = vpop.f32.mrb[1].mxu1 }
 0x21e   :  { %v285_v35 = vadd.f32 %v284_v34, %v172_v31  ;;  %v286_v36 = vpop.f32.mrb[2].mxu1 }
 0x21f   :  { %v287_v38 = vadd.f32 %v286_v36, %v168_v30  ;;  %v288_v39 = vpop.f32.mrb[3].mxu1 }
 0x220   :  { %v379_v40 = vpack.c.bf16 %v285_v35, %v283_v33  ;;  %v289_v41 = vadd.f32 %v288_v39, %v172_v31  ;;  %v272_v42 = vpop.f32.mrb[0].mxu0 }
 0x221   :  { %v273_v43 = vadd.f32 %v272_v42, %v168_v30  ;;  %v274_v44 = vpop.f32.mrb[1].mxu0 }
 0x222   :  { %336 = vst.msk [vmem:[%s572_s5 + $0x10] sm:$0xff] %vm540_vm6, %v379_v40  ;;  %v380_v45 = vpack.c.bf16 %v289_v41, %v287_v38  ;;  %v275_v46 = vadd.f32 %v274_v44, %v172_v31  ;;  %v276_v47 = vpop.f32.mrb[2].mxu0 }
 0x223   :  { %v277_v48 = vadd.f32 %v276_v47, %v168_v30  ;;  %v278_v49 = vpop.f32.mrb[3].mxu0 }
 0x224   :  { %337 = vst.msk [vmem:[%s572_s5 + $0x18] sm:$0xff] %vm540_vm6, %v380_v45  ;;  %v377_v50 = vpack.c.bf16 %v275_v46, %v273_v43  ;;  %v279_v51 = vadd.f32 %v278_v49, %v172_v31  ;;  %v292_v52 = vpop.f32.mrb[4].mxu1 }
 0x225   :  { %v293_v53 = vadd.f32 %v292_v52, %v168_v30  ;;  %v294_v54 = vpop.f32.mrb[5].mxu1 }
 0x226   :  { %334 = vst.msk [vmem:[%s572_s5] sm:$0xff] %vm540_vm6, %v377_v50  ;;  %v378_v55 = vpack.c.bf16 %v279_v51, %v277_v48  ;;  %v295_v56 = vadd.f32 %v294_v54, %v172_v31  ;;  %v296_v57 = vpop.f32.mrb[6].mxu1 }
 0x227   :  { %v297_v58 = vpop.f32.mrb[7].mxu1 }
 0x228   :  { %335 = vst.msk [vmem:[%s572_s5 + $0x8] sm:$0xff] %vm540_vm6, %v378_v55  ;;  %v381_v59 = vpack.c.bf16 %v295_v56, %v293_v53 }
 0x22a   :  { %341 = vst.msk [vmem:[%s572_s5 + $0x20] sm:$0x11] %vm340_vm9, %v381_v59 }

// kernel: vit_forward.14
= control target key start
LH: loop header
LB: loop body
LE: loop exit
PB: predicated region body
PF: predicated region fallthrough
CT: control target
= control target key end

     0   :  { %s1311_s6 = smov 0   ;;  %s1514_s0 = inlined_call_operand.vmem [shape: bf16[2,17,192], index: 0, kind: input, shape index: {}]   ;;  %s1515_s1 = inlined_call_operand.vmem [shape: bf16[2,17,64], index: 1, kind: output, shape index: {}]  }
   0x1 LB: > { %s1034_s7 = sadd.s32 4294967295, %s1291_s6   ;;  %p1038_p0 = scmp.ge.s32.totalorder %s1291_s6, 1  ;;  %s1291_s6 = sphi %s1311_s6, %s11_s6  }
   0x2   : > { %p87_p1 = scmp.lt.s32.totalorder %s1291_s6, 3 }
   0x4   : > { %p88_p2 = pnand %p1038_p0, %p87_p1 }
   0x5   : > { %p107_p3 = scmp.lt.s32.totalorder (!%p88_p2), %s1034_s7, 1  ;;  %vm136_vm0 = vcmask (!%p88_p2), 130048   ;;  %s1293_s12 = smov (!%p88_p2), 64   ;;  %vm207_vm1 = vcmask (!%p88_p2), 131072   ;;  %vm200_vm2 = vcmask (!%p88_p2), 138240   ;;  %vm246_vm3 = vcmask (!%p88_p2), 1040384  }
   0x6   : > { %91 = sbr.rel (%p88_p2) target bundleno = 2103 (0x837), region = 24  ;;  %s1294_s13 = smov (!%p88_p2), 48   ;;  %v1295_v20 = vmov (!%p88_p2), 0   ;;  %vm322_vm4 = vcmask (!%p88_p2), 122880   ;;  %vm323_vm5 = vsmask.f32 (!%p88_p2), 256 }
   0x7   : > { %v1343_v21 = vsel (!%p88_p2), %vm246_vm3, 65535, %v1295_v20  ;;  %s1296_s14 = smov (!%p88_p2), 112   ;;  %s1297_s15 = smov (!%p88_p2), 32   ;;  %vm319_vm6 = vcmask (!%p88_p2), 125952   ;;  %vm324_vm7 = vmand (!%p88_p2), %vm322_vm4, %vm323_vm5  ;;  %vm540_vm8 = vcmask (!%p88_p2), 254080   ;;  %vm537_vm9 = vcmask (!%p88_p2), 257152  }
   0x8   : > { %s1298_s16 = smov (!%p88_p2), 96   ;;  %s1299_s17 = smov (!%p88_p2), 16   ;;  %vm541_vm10 = vmand (!%p88_p2), %vm540_vm8, %vm323_vm5  ;;  %vm754_vm11 = vcmask (!%p88_p2), 388352   ;;  %vm757_vm12 = vcmask (!%p88_p2), 385280   ;;  %vm974_vm14 = vcmask (!%p88_p2), 516480  }
   0x9   : > { %s1300_s18 = smov (!%p88_p2), 80   ;;  %vm758_vm13 = vmand (!%p88_p2), %vm757_vm12, %vm323_vm5 }
   0xa   : > { %vm975_vm15 = vmand (!%p88_p2), %vm974_vm14, %vm323_vm5 }
   0xd   : > { %s1517_s7 = smov (!%p107_p3, %s1034_s7), 1 }
   0xe   : > { %s1203_s8 = smul.u32 24, %s1517_s7 }
   0xf   : > { %s1204_s19 = smul.u32 12, %s1517_s7 }
  0x10   : > { %s1325_s11 = scalar_lea.vmem %s1514_s0, %s1203_s8 }
  0x11   : > { %v1221_v0 = vld [vmem:[%s1325_s11] ss:$8 sps:$4 sm:$0xff]   ;;  %v1222_v1 = vld [vmem:[%s1325_s11 + $0x10] ss:$0 sps:$4 sm:$0x11]   ;;  %s1483_s22 = scalar_lea.vmem %s1515_s1, %s1204_s19 }
  0x12   : > { %132 = vrot.lane.b32.xlu0 %v1221_v0, %s1293_s12  ;;  %1135 = vmatprep.mubr.msk.bf16.mxu0 %vm136_vm0, %v1221_v0  ;;  %v1223_v16 = vld [vmem:[%s1325_s11] ss:$8 sps:$4 sm:$0xff]   ;;  %v1225_v17 = vld [vmem:[%s1325_s11 + $0x4] ss:$8 sps:$4 sm:$0xff]  }
  0x13   : > { %v1224_v18 = vld [vmem:[%s1325_s11 + $0x10] ss:$0 sps:$4 sm:$0x11]   ;;  %1139 = vmatprep.subr.bf16.mxu1 %v1225_v17  ;;  %v1226_v19 = vld [vmem:[%s1325_s11 + $0x14] ss:$0 sps:$4 sm:$0x11]  }
  0x14   : > { %1140 = vmatpush3.bf16.msra.mxu1 %v1225_v17  ;;  %v250_v22 = vand.u32 %v1226_v19, %v1343_v21  ;;  %v1230_v55 = vld [vmem:[%s1325_s11 + $0x10] ss:$0 sps:$4 sm:$0x11]   ;;  %v1227_v56 = vld [vmem:[%s1325_s11 + $0x4] ss:$8 sps:$4 sm:$0xff]  }
  0x15   : > { %v1228_v57 = vld [vmem:[%s1325_s11 + $0x14] ss:$0 sps:$4 sm:$0x11]   ;;  %v1229_v60 = vld [vmem:[%s1325_s11] ss:$8 sps:$4 sm:$0xff]  }
  0x16   : > { %134 = vrot.lane.b32.xlu0 %v1222_v1, %s1293_s12  ;;  %1141 = vmatprep.subr.bf16.mxu1 %v250_v22  ;;  %v1231_v61 = vld [vmem:[%s1325_s11 + $0x4] ss:$8 sps:$4 sm:$0xff]  }
  0x18   : > { %1142 = vmatpush3.bf16.msra.mxu1 %v250_v22 }
  0x84   : > { %v133_v2 = vpop.permute.xlu0 %132 }
  0x85   : > { %1195 = vmatprep.subr.msk.bf16.mxu0 %vm136_vm0, %v133_v2  ;;  %v144_v3 = vsel %vm136_vm0, %v133_v2, 0 }
  0x86   : > { %1132 = vmatpush3.bf16.xpose.msra.mxu0 %v144_v3 }
  0x88   : > { %v135_v4 = vpop.permute.xlu0 %134 }
  0x89   : > { %1196 = vmatprep.subr.msk.bf16.mxu0 %vm136_vm0, %v135_v4  ;;  %v147_v5 = vsel %vm136_vm0, %v135_v4, 0 }
  0x8e   : > { %1134 = vmatpush3.bf16.xpose.msra.mxu0 %v147_v5 }
  0x95   : > { %1136 = vmatmul.mubr.msk.bf16.vlgmr.msra.gmra.mrb[0].mxu0 %vm136_vm0, %v1222_v1 }
 0x168   : > { %v1137_v6 = vpop.f32.mrb[0].mxu0 }
 0x169   : > { %v199_v7 = vmul.f32 0.25, %v1137_v6  ;;  %v183_v8 = vpop.f32.mrb[1].mxu0 }
 0x16a   : > { %v197_v9 = vmul.f32 0.25, %v183_v8  ;;  %v1138_v10 = vpop.f32.mrb[2].mxu0 }
 0x16b   : > { %v186_v11 = vpop.f32.mrb[3].mxu0  ;;  %v208_v12 = vsel %vm207_vm1, %v199_v7, -inf }
 0x16c   : > { %v198_v13 = vmul.f32 0.25, %v186_v11  ;;  %209 = vmax.xlane.f32.xlu0 %v208_v12  ;;  %v201_v14 = vsel %vm200_vm2, %v197_v9, -inf }
 0x16d   : > { %202 = vmax.xlane.f32.xlu1 %v201_v14 }
 0x16e   : > { %v204_v15 = vsel %vm200_vm2, %v198_v13, -inf }
 0x171   : > { %205 = vmax.xlane.f32.xlu1 %v204_v15 }
 0x182   : > { %346 = vrot.lane.b32.xlu1 %v1223_v16, %s1294_s13 }
 0x186   : > { %348 = vrot.lane.b32.xlu1 %v1224_v18, %s1294_s13 }
 0x18a   : > { %342 = vrot.lane.b32.xlu1 %v1223_v16, %s1296_s14 }
 0x18e   : > { %344 = vrot.lane.b32.xlu1 %v1224_v18, %s1296_s14 }
 0x1f9   : > { %v210_v23 = vpop.xlane.xlu0 %209 }
 0x1fa   : > { %v213_v24 = vsub.f32 %v199_v7, %v210_v23  ;;  %v203_v25 = vpop.xlane.xlu1 %202 }
 0x1fb   : > { %v211_v26 = vsub.f32 %v197_v9, %v203_v25 }
 0x1fc   : > { %v218_v27 = vmul.f32 1.442695, %v213_v24 }
 0x1fd   : > { %v214_v28 = vmul.f32 1.442695, %v211_v26 }
 0x1fe   : > { %v206_v29 = vpop.xlane.xlu1 %205  ;;  %1237 = vpow2.f32 %v218_v27 }
 0x1ff   : > { %v212_v30 = vsub.f32 %v198_v13, %v206_v29  ;;  %1239 = vpow2.f32 %v214_v28 }
 0x201   : > { %v216_v31 = vmul.f32 1.442695, %v212_v30 }
 0x202   : > { %v347_v32 = vpop.permute.xlu1 %346 }
 0x203   : > { %1241 = vpow2.f32 %v216_v31  ;;  %1197 = vmatprep.subr.msk.bf16.mxu1 %vm136_vm0, %v347_v32  ;;  %v357_v38 = vsel %vm136_vm0, %v347_v32, 0 }
 0x206   : > { %v349_v33 = vpop.permute.xlu1 %348 }
 0x207   : > { %v360_v41 = vsel %vm136_vm0, %v349_v33, 0 }
 0x208   : > { %v1350_v34 = vpop.eup %1237 }
 0x209   : > { %v1352_v35 = vpop.eup %1239  ;;  %v230_v39 = vpack.c.bf16 %v1350_v34, %v1350_v34 }
 0x20a   : > { %v343_v40 = vpop.permute.xlu1 %342 }
 0x20d   : > { %v1354_v36 = vpop.eup %1241 }
 0x20e   : > { %v229_v37 = vpack.c.bf16 %v1354_v36, %v1352_v35  ;;  %v345_v42 = vpop.permute.xlu1 %344 }
 0x210   : > { %1143 = vmatprep.mubr.msk.bf16.mxu1 %vm200_vm2, %v229_v37 }
 0x211   : > { %1144 = vmatmul.mubr.msk.bf16.vlgmr.msra.gmra.mrb[0].mxu1 %vm200_vm2, %v230_v39 }
 0x212   : > { %1148 = vmatpush3.bf16.xpose.msra.mxu1 %v357_v38  ;;  %1151 = vmatprep.mubr.msk.bf16.mxu1 %vm136_vm0, %v343_v40  ;;  %v1232_v40 = vld [vmem:[%s1325_s11 + $0x14] ss:$0 sps:$4 sm:$0x11]  }
 0x213   : > { %1198 = vmatprep.subr.msk.bf16.mxu1 %vm136_vm0, %v349_v33 }
 0x21a   : > { %1150 = vmatpush3.bf16.xpose.msra.mxu1 %v360_v41  ;;  %v1234_v41 = vld [vmem:[%s1325_s11 + $0x10] ss:$0 sps:$4 sm:$0x11]  }
 0x221   : > { %1152 = vmatmul.mubr.msk.bf16.vlgmr.msra.gmra.mrb[4].mxu1 %vm136_vm0, %v345_v42  ;;  %v1233_v42 = vld [vmem:[%s1325_s11] ss:$8 sps:$4 sm:$0xff]  }
 0x2e4   : > { %v1367_v43 = vpop.f32.mrb[0].mxu1 }
 0x2e5   : > { %v1369_v44 = vpop.f32.mrb[1].mxu1 }
 0x2e6   : > { %v1146_v45 = vpop.f32.mrb[2].mxu1 }
 0x2e7   : > { %v1371_v46 = vpop.f32.mrb[3].mxu1 }
 0x2f4   : > { %v1153_v47 = vpop.f32.mrb[4].mxu1 }
 0x2f5   : > { %v412_v48 = vmul.f32 0.25, %v1153_v47  ;;  %v396_v49 = vpop.f32.mrb[5].mxu1 }
 0x2f6   : > { %v410_v50 = vmul.f32 0.25, %v396_v49  ;;  %v1154_v51 = vpop.f32.mrb[6].mxu1 }
 0x2f7   : > { %v399_v52 = vpop.f32.mrb[7].mxu1  ;;  %v419_v53 = vsel %vm207_vm1, %v412_v48, -inf }
 0x2f8   : > { %420 = vmax.xlane.f32.xlu0 %v419_v53  ;;  %v413_v54 = vsel %vm200_vm2, %v410_v50, -inf  ;;  %v411_v58 = vmul.f32 0.25, %v399_v52 }
 0x2f9   : > { %414 = vmax.xlane.f32.xlu1 %v413_v54 }
 0x2fa   : > { %v416_v59 = vsel %vm200_vm2, %v411_v58, -inf }
 0x30a   : > { %565 = vrot.lane.b32.xlu1 %v1230_v55, %s1297_s15 }
 0x30e   : > { %450 = vrot.lane.b32.xlu0 %v1227_v56, %s1296_s14 }
 0x312   : > { %452 = vrot.lane.b32.xlu0 %v1228_v57, %s1296_s14 }
 0x331   : > { %417 = vmax.xlane.f32.xlu0 %v416_v59 }
 0x347   : > { %563 = vrot.lane.b32.xlu0 %v1229_v60, %s1297_s15 }
 0x34b   : > { %559 = vrot.lane.b32.xlu0 %v1229_v60, %s1298_s16 }
 0x34f   : > { %561 = vrot.lane.b32.xlu0 %v1230_v55, %s1298_s16 }
 0x353   : > { %667 = vrot.lane.b32.xlu0 %v1231_v61, %s1298_s16 }
 0x385   : > { %v421_v62 = vpop.xlane.xlu0 %420 }
 0x386   : > { %v415_v2 = vpop.xlane.xlu1 %414  ;;  %v424_v3 = vsub.f32 %v412_v48, %v421_v62 }
 0x387   : > { %v422_v4 = vsub.f32 %v410_v50, %v415_v2 }
 0x388   : > { %v429_v5 = vmul.f32 1.442695, %v424_v3 }
 0x389   : > { %v451_v63 = vpop.permute.xlu0 %450  ;;  %v425_v6 = vmul.f32 1.442695, %v422_v4 }
 0x38a   : > { %1155 = vmatprep.subr.bf16.mxu0 %v451_v63  ;;  %1243 = vpow2.f32 %v429_v5  ;;  %v566_v18 = vpop.permute.xlu1 %565 }
 0x38b   : > { %1156 = vmatpush3.bf16.msra.mxu0 %v451_v63  ;;  %1245 = vpow2.f32 %v425_v6  ;;  %v577_v19 = vsel %vm136_vm0, %v566_v18, 0 }
 0x38d   : > { %v453_v0 = vpop.permute.xlu0 %452 }
 0x38e   : > { %v462_v1 = vand.u32 %v453_v0, %v1343_v21 }
 0x390   : > { %1157 = vmatprep.subr.bf16.mxu0 %v462_v1 }
 0x391   : > { %1158 = vmatpush3.bf16.msra.mxu0 %v462_v1 }
 0x394   : > { %v1390_v11 = vpop.eup %1243 }
 0x395   : > { %v1392_v12 = vpop.eup %1245  ;;  %v441_v16 = vpack.c.bf16 %v1390_v11, %v1390_v11 }
 0x3be   : > { %v418_v7 = vpop.xlane.xlu0 %417 }
 0x3bf   : > { %v423_v8 = vsub.f32 %v411_v58, %v418_v7 }
 0x3c1   : > { %v427_v9 = vmul.f32 1.442695, %v423_v8 }
 0x3c2   : > { %v564_v10 = vpop.permute.xlu0 %563 }
 0x3c3   : > { %1247 = vpow2.f32 %v427_v9  ;;  %1199 = vmatprep.subr.msk.bf16.mxu0 %vm136_vm0, %v564_v10  ;;  %v574_v15 = vsel %vm136_vm0, %v564_v10, 0 }
 0x3c6   : > { %v560_v17 = vpop.permute.xlu0 %559 }
 0x3ca   : > { %v562_v20 = vpop.permute.xlu0 %561 }
 0x3cd   : > { %v1394_v13 = vpop.eup %1247 }
 0x3ce   : > { %v440_v14 = vpack.c.bf16 %v1394_v13, %v1392_v12  ;;  %v668_v22 = vpop.permute.xlu0 %667 }
 0x3cf   : > { %1171 = vmatprep.subr.bf16.mxu1 %v668_v22 }
 0x3d0   : > { %1159 = vmatprep.mubr.msk.bf16.mxu0 %vm200_vm2, %v440_v14  ;;  %1172 = vmatpush3.bf16.msra.mxu1 %v668_v22  ;;  %v1235_v22 = vld [vmem:[%s1325_s11 + $0x14] ss:$0 sps:$4 sm:$0x11]  }
 0x3d1   : > { %1160 = vmatmul.mubr.msk.bf16.vlgmr.msra.gmra.mrb[4].mxu0 %vm200_vm2, %v441_v16 }
 0x3d2   : > { %1164 = vmatpush3.bf16.xpose.msra.mxu0 %v574_v15  ;;  %1167 = vmatprep.mubr.msk.bf16.mxu0 %vm136_vm0, %v560_v17 }
 0x3d3   : > { %1200 = vmatprep.subr.msk.bf16.mxu0 %vm136_vm0, %v566_v18 }
 0x3da   : > { %1166 = vmatpush3.bf16.xpose.msra.mxu0 %v577_v19 }
 0x3e1   : > { %1168 = vmatmul.mubr.msk.bf16.vlgmr.msra.gmra.mrb[8].mxu0 %vm136_vm0, %v562_v20 }
 0x4a4   : > { %v1407_v23 = vpop.f32.mrb[4].mxu0 }
 0x4a5   : > { %v1409_v24 = vpop.f32.mrb[5].mxu0 }
 0x4a6   : > { %v1162_v25 = vpop.f32.mrb[6].mxu0 }
 0x4a7   : > { %v1411_v26 = vpop.f32.mrb[7].mxu0  ;;  %v1236_v25 = vld [vmem:[%s1325_s11 + $0x4] ss:$8 sps:$4 sm:$0xff]  }
 0x4b4   : > { %v1169_v27 = vpop.f32.mrb[8].mxu0 }
 0x4b5   : > { %v629_v28 = vmul.f32 0.25, %v1169_v27  ;;  %v613_v29 = vpop.f32.mrb[9].mxu0  ;;  %v437_v27 = vsel %vm207_vm1, %v1390_v11, 0.0 }
 0x4b6   : > { %v1170_v30 = vpop.f32.mrb[10].mxu0  ;;  %v627_v31 = vmul.f32 0.25, %v613_v29  ;;  %v434_v29 = vsel %vm200_vm2, %v1394_v13, 0.0 }
 0x4b7   : > { %v616_v32 = vpop.f32.mrb[11].mxu0  ;;  %v636_v33 = vsel %vm207_vm1, %v629_v28, -inf  ;;  %v431_v30 = vsel %vm200_vm2, %v1392_v12, 0.0 }
 0x4b8   : > { %v628_v37 = vmul.f32 0.25, %v616_v32  ;;  %637 = vmax.xlane.f32.xlu0 %v636_v33  ;;  %v630_v39 = vsel %vm200_vm2, %v627_v31, -inf }
 0x4ba   : > { %v633_v38 = vsel %vm200_vm2, %v628_v37, -inf }
 0x4bb   : > { %634 = vmax.xlane.f32.xlu1 %v633_v38 }
 0x4bc   : > { %631 = vmax.xlane.f32.xlu0 %v630_v39 }
 0x4cc   : > { %669 = vrot.lane.b32.xlu1 %v1232_v40, %s1298_s16 }
 0x4d0   : > { %782 = vrot.lane.b32.xlu1 %v1234_v41, %s1299_s17 }
 0x4d2   : > { %780 = vrot.lane.b32.xlu0 %v1233_v42, %s1299_s17 }
 0x4d4   : > { %778 = vrot.lane.b32.xlu1 %v1234_v41, %s1300_s18 }
 0x4d6   : > { %776 = vrot.lane.b32.xlu0 %v1233_v42, %s1300_s18 }
 0x545   : > { %v638_v45 = vpop.xlane.xlu0 %637 }
 0x546   : > { %v641_v47 = vsub.f32 %v629_v28, %v638_v45 }
 0x548   : > { %v646_v48 = vmul.f32 1.442695, %v641_v47  ;;  %v635_v49 = vpop.xlane.xlu1 %634 }
 0x549   : > { %v640_v50 = vsub.f32 %v628_v37, %v635_v49  ;;  %v632_v51 = vpop.xlane.xlu0 %631 }
 0x54a   : > { %v639_v52 = vsub.f32 %v627_v31, %v632_v51  ;;  %1249 = vpow2.f32 %v646_v48 }
 0x54b   : > { %v644_v53 = vmul.f32 1.442695, %v640_v50 }
 0x54c   : > { %v642_v54 = vmul.f32 1.442695, %v639_v52  ;;  %v670_v55 = vpop.permute.xlu1 %669 }
 0x54d   : > { %1251 = vpow2.f32 %v644_v53  ;;  %v679_v56 = vand.u32 %v670_v55, %v1343_v21  ;;  %v781_v57 = vpop.permute.xlu0 %780 }
 0x54e   : > { %1253 = vpow2.f32 %v642_v54  ;;  %v791_v62 = vsel %vm136_vm0, %v781_v57, 0 }
 0x54f   : > { %1173 = vmatprep.subr.bf16.mxu1 %v679_v56 }
 0x550   : > { %1174 = vmatpush3.bf16.msra.mxu1 %v679_v56  ;;  %v783_v1 = vpop.permute.xlu1 %782  ;;  %v220_v56 = vsel %vm200_vm2, %v1352_v35, 0.0 }
 0x551   : > { %1201 = vmatprep.subr.msk.bf16.mxu1 %vm136_vm0, %v781_v57  ;;  %v777_v0 = vpop.permute.xlu0 %776  ;;  %v794_v2 = vsel %vm136_vm0, %v783_v1, 0  ;;  %v223_v57 = vsel %vm200_vm2, %v1354_v36, 0.0 }
 0x554   : > { %v1250_v58 = vpop.eup %1249  ;;  %v779_v3 = vpop.permute.xlu1 %778 }
 0x555   : > { %v658_v63 = vpack.c.bf16 %v1250_v58, %v1250_v58  ;;  %v654_v28 = vsel %vm207_vm1, %v1250_v58, 0.0 }
 0x557   : > { %v1252_v59 = vpop.eup %1251 }
 0x558   : > { %v1254_v60 = vpop.eup %1253  ;;  %v651_v31 = vsel %vm200_vm2, %v1252_v59, 0.0 }
 0x559   : > { %v657_v61 = vpack.c.bf16 %v1252_v59, %v1254_v60  ;;  %v648_v32 = vsel %vm200_vm2, %v1254_v60, 0.0 }
 0x55b   : > { %1175 = vmatprep.mubr.msk.bf16.mxu1 %vm200_vm2, %v657_v61 }
 0x55c   : > { %1176 = vmatmul.mubr.msk.bf16.vlgmr.msra.gmra.mrb[8].mxu1 %vm200_vm2, %v658_v63 }
 0x55d   : > { %1180 = vmatpush3.bf16.xpose.msra.mxu1 %v791_v62  ;;  %1183 = vmatprep.mubr.msk.bf16.mxu1 %vm136_vm0, %v777_v0 }
 0x55e   : > { %1202 = vmatprep.subr.msk.bf16.mxu1 %vm136_vm0, %v783_v1 }
 0x565   : > { %1182 = vmatpush3.bf16.xpose.msra.mxu1 %v794_v2 }
 0x56c   : > { %1184 = vmatmul.mubr.msk.bf16.vlgmr.msra.gmra.mrb[12].mxu1 %vm136_vm0, %v779_v3  ;;  %vm971_vm0 = vcmask 519552  }
 0x62f   : > { %v1433_v4 = vpop.f32.mrb[8].mxu1 }
 0x630   : > { %v1435_v5 = vpop.f32.mrb[9].mxu1 }
 0x631   : > { %v1178_v6 = vpop.f32.mrb[10].mxu1 }
 0x632   : > { %v1437_v7 = vpop.f32.mrb[11].mxu1 }
 0x63f   : > { %v1185_v8 = vpop.f32.mrb[12].mxu1 }
 0x640   : > { %v846_v9 = vmul.f32 0.25, %v1185_v8  ;;  %v830_v10 = vpop.f32.mrb[13].mxu1 }
 0x641   : > { %v1186_v14 = vpop.f32.mrb[14].mxu1  ;;  %v844_v15 = vmul.f32 0.25, %v830_v10 }
 0x642   : > { %v833_v16 = vpop.f32.mrb[15].mxu1  ;;  %v853_v17 = vsel %vm207_vm1, %v846_v9, -inf }
 0x643   : > { %v845_v18 = vmul.f32 0.25, %v833_v16  ;;  %854 = vmax.xlane.f32.xlu0 %v853_v17  ;;  %v847_v20 = vsel %vm200_vm2, %v844_v15, -inf }
 0x645   : > { %v850_v19 = vsel %vm200_vm2, %v845_v18, -inf }
 0x646   : > { %851 = vmax.xlane.f32.xlu1 %v850_v19 }
 0x647   : > { %848 = vmax.xlane.f32.xlu0 %v847_v20 }
 0x657   : > { %886 = vrot.lane.b32.xlu1 %v1235_v22, %s1300_s18 }
 0x65d   : > { %884 = vrot.lane.b32.xlu0 %v1236_v25, %s1300_s18 }
 0x67b   : > { %438 = vadd.xlane.f32.xlu1 %v437_v27 }
 0x67c   : > { %655 = vadd.xlane.f32.xlu0 %v654_v28 }
 0x67f   : > { %435 = vadd.xlane.f32.xlu1 %v434_v29  ;;  %v325_v29 = vld [vmem:[%s1483_s22 + $0x8] sm:$0x1] }
 0x680   : > { %432 = vadd.xlane.f32.xlu0 %v431_v30 }
 0x683   : > { %652 = vadd.xlane.f32.xlu1 %v651_v31 }
 0x684   : > { %649 = vadd.xlane.f32.xlu0 %v648_v32 }
 0x6d0   : > { %v855_v33 = vpop.xlane.xlu0 %854 }
 0x6d1   : > { %v858_v11 = vsub.f32 %v846_v9, %v855_v33 }
 0x6d3   : > { %v863_v37 = vmul.f32 1.442695, %v858_v11  ;;  %v852_v38 = vpop.xlane.xlu1 %851 }
 0x6d4   : > { %v857_v39 = vsub.f32 %v845_v18, %v852_v38  ;;  %v849_v40 = vpop.xlane.xlu0 %848 }
 0x6d5   : > { %1255 = vpow2.f32 %v863_v37  ;;  %v856_v41 = vsub.f32 %v844_v15, %v849_v40 }
 0x6d6   : > { %v861_v13 = vmul.f32 1.442695, %v857_v39 }
 0x6d7   : > { %v859_v42 = vmul.f32 1.442695, %v856_v41  ;;  %v887_v45 = vpop.permute.xlu1 %886 }
 0x6d8   : > { %1257 = vpow2.f32 %v861_v13  ;;  %v885_v12 = vpop.permute.xlu0 %884  ;;  %v896_v47 = vand.u32 %v887_v45, %v1343_v21  ;;  %v226_v21 = vsel %vm207_vm1, %v1350_v34, 0.0 }
 0x6d9   : > { %1259 = vpow2.f32 %v859_v42  ;;  %1187 = vmatprep.subr.bf16.mxu0 %v885_v12 }
 0x6da   : > { %1188 = vmatpush3.bf16.msra.mxu0 %v885_v12 }
 0x6db   : > { %1189 = vmatprep.subr.bf16.mxu0 %v896_v47 }
 0x6de   : > { %1190 = vmatpush3.bf16.msra.mxu0 %v896_v47 }
 0x6df   : > { %v1256_v48 = vpop.eup %1255 }
 0x6e0   : > { %v871_v49 = vsel %vm207_vm1, %v1256_v48, 0.0  ;;  %v875_v55 = vpack.c.bf16 %v1256_v48, %v1256_v48 }
 0x6e1   : > { %872 = vadd.xlane.f32.xlu0 %v871_v49 }
 0x6e2   : > { %v1258_v50 = vpop.eup %1257 }
 0x6e3   : > { %v1260_v51 = vpop.eup %1259  ;;  %v868_v52 = vsel %vm200_vm2, %v1258_v50, 0.0 }
 0x6e4   : > { %v865_v53 = vsel %vm200_vm2, %v1260_v51, 0.0  ;;  %v874_v54 = vpack.c.bf16 %v1258_v50, %v1260_v51 }
 0x6e5   : > { %866 = vadd.xlane.f32.xlu1 %v865_v53  ;;  %869 = vadd.xlane.f32.xlu0 %v868_v52 }
 0x6e6   : > { %1191 = vmatprep.mubr.msk.bf16.mxu0 %vm200_vm2, %v874_v54 }
 0x6e7   : > { %1192 = vmatmul.mubr.msk.bf16.vlgmr.msra.gmra.mrb[12].mxu0 %vm200_vm2, %v875_v55 }
 0x6e9   : > { %227 = vadd.xlane.f32.xlu1 %v226_v21  ;;  %221 = vadd.xlane.f32.xlu0 %v220_v56 }
 0x6ed   : > { %224 = vadd.xlane.f32.xlu1 %v223_v57 }
 0x708   : > { %v439_v58 = vpop.xlane.xlu1 %438 }
 0x709   : > { %1261 = vrcp.f32 %v439_v58  ;;  %v656_v59 = vpop.xlane.xlu0 %655 }
 0x70a   : > { %1263 = vrcp.f32 %v656_v59 }
 0x70c   : > { %v436_v60 = vpop.xlane.xlu1 %435 }
 0x70d   : > { %1265 = vrcp.f32 %v436_v60  ;;  %v433_v61 = vpop.xlane.xlu0 %432 }
 0x70e   : > { %1267 = vrcp.f32 %v433_v61 }
 0x710   : > { %v653_v62 = vpop.xlane.xlu1 %652 }
 0x711   : > { %1269 = vrcp.f32 %v653_v62  ;;  %v650_v34 = vpop.xlane.xlu0 %649 }
 0x712   : > { %1271 = vrcp.f32 %v650_v34 }
 0x713   : > { %v1262_v63 = vpop.eup %1261 }
 0x714   : > { %v1264_v35 = vpop.eup %1263  ;;  %v517_v0 = vmul.f32 %v1262_v63, %v1407_v23 }
 0x715   : > { %v734_v1 = vmul.f32 %v1264_v35, %v1433_v4 }
 0x716   : > { %v1092_v36 = vpack.c.bf16 %v517_v0, %v517_v0 }
 0x717   : > { %v1266_v2 = vpop.eup %1265  ;;  %v1095_v3 = vpack.c.bf16 %v734_v1, %v734_v1 }
 0x718   : > { %v1268_v6 = vpop.eup %1267  ;;  %532 = vrot.lane.b32.xlu0 %v1092_v36, %s1299_s17  ;;  %v516_v8 = vmul.f32 %v1266_v2, %v1411_v26 }
 0x719   : > { %749 = vrot.lane.b32.xlu1 %v1095_v3, %s1297_s15  ;;  %v515_v9 = vmul.f32 %v1268_v6, %v1409_v24 }
 0x71a   : > { %v1091_v10 = vpack.c.bf16 %v516_v8, %v516_v8 }
 0x71b   : > { %v1270_v14 = vpop.eup %1269  ;;  %v1090_v15 = vpack.c.bf16 %v515_v9, %v515_v9 }
 0x71c   : > { %v1272_v16 = vpop.eup %1271  ;;  %530 = vrot.lane.b32.xlu0 %v1091_v10, %s1299_s17  ;;  %v733_v23 = vmul.f32 %v1270_v14, %v1437_v7 }
 0x71d   : > { %528 = vrot.lane.b32.xlu1 %v1090_v15, %s1299_s17  ;;  %v732_v4 = vmul.f32 %v1272_v16, %v1435_v5 }
 0x71e   : > { %v1094_v17 = vpack.c.bf16 %v733_v23, %v733_v23 }
 0x71f   : > { %v1093_v18 = vpack.c.bf16 %v732_v4, %v732_v4 }
 0x720   : > { %747 = vrot.lane.b32.xlu0 %v1094_v17, %s1297_s15 }
 0x721   : > { %745 = vrot.lane.b32.xlu1 %v1093_v18, %s1297_s15 }
 0x76e   : > { %v873_v24 = vpop.xlane.xlu0 %872 }
 0x772   : > { %v870_v26 = vpop.xlane.xlu0 %869  ;;  %v867_v19 = vpop.xlane.xlu1 %866 }
 0x776   : > { %v222_v20 = vpop.xlane.xlu0 %221  ;;  %v228_v22 = vpop.xlane.xlu1 %227 }
 0x777   : > { %1273 = vrcp.f32 %v222_v20 }
 0x778   : > { %1275 = vrcp.f32 %v228_v22 }
 0x77a   : > { %v225_v25 = vpop.xlane.xlu1 %224 }
 0x77b   : > { %1277 = vrcp.f32 %v225_v25 }
 0x77c   : > { %1279 = vrcp.f32 %v873_v24 }
 0x77d   : > { %1281 = vrcp.f32 %v867_v19 }
 0x77e   : > { %1283 = vrcp.f32 %v870_v26 }
 0x781   : > { %v1274_v7 = vpop.eup %1273 }
 0x782   : > { %v1276_v5 = vpop.eup %1275  ;;  %v303_v27 = vmul.f32 %v1274_v7, %v1369_v44 }
 0x783   : > { %v305_v28 = vmul.f32 %v1276_v5, %v1367_v43 }
 0x784   : > { %v1087_v30 = vpack.c.bf16 %v303_v27, %v303_v27 }
 0x785   : > { %v1278_v31 = vpop.eup %1277  ;;  %v1089_v32 = vpack.c.bf16 %v305_v28, %v305_v28 }
 0x786   : > { %v304_v33 = vmul.f32 %v1278_v31, %v1371_v46  ;;  %320 = vst.msk [vmem:[%s1483_s22] sm:$0xf] %vm319_vm6, %v1087_v30  ;;  %v1280_v12 = vpop.eup %1279 }
 0x787   : > { %v326_v11 = vsel %vm324_vm7, %v1089_v32, %v325_v29  ;;  %v1282_v48 = vpop.eup %1281 }
 0x788   : > { %327 = vst [vmem:[%s1483_s22 + $0x8] sm:$0x1] %v326_v11  ;;  %v1088_v37 = vpack.c.bf16 %v304_v33, %v304_v33  ;;  %v1284_v53 = vpop.eup %1283 }
 0x78a   : > { %v533_v43 = vpop.permute.xlu0 %532  ;;  %321 = vst.msk [vmem:[%s1483_s22 + $0x4] sm:$0xf] %vm319_vm6, %v1088_v37 }
 0x78b   : > { %v750_v44 = vpop.permute.xlu1 %749 }
 0x78e   : > { %v531_v38 = vpop.permute.xlu0 %530 }
 0x78f   : > { %v542_v39 = vld [vmem:[%s1483_s22 + $0x8] sm:$0x1]  ;;  %539 = vst.msk [vmem:[%s1483_s22 + $0x4] sm:$0xf] %vm537_vm9, %v531_v38  ;;  %v529_v46 = vpop.permute.xlu1 %528 }
 0x790   : > { %v543_v40 = vsel %vm541_vm10, %v533_v43, %v542_v39  ;;  %538 = vst.msk [vmem:[%s1483_s22] sm:$0xf] %vm537_vm9, %v529_v46 }
 0x791   : > { %544 = vst [vmem:[%s1483_s22 + $0x8] sm:$0x1] %v543_v40 }
 0x792   : > { %v748_v41 = vpop.permute.xlu0 %747 }
 0x793   : > { %756 = vst.msk [vmem:[%s1483_s22 + $0x4] sm:$0xf] %vm754_vm11, %v748_v41  ;;  %v746_v13 = vpop.permute.xlu1 %745 }
 0x794   : > { %755 = vst.msk [vmem:[%s1483_s22] sm:$0xf] %vm754_vm11, %v746_v13 }
 0x798   : > { %v759_v42 = vld [vmem:[%s1483_s22 + $0x8] sm:$0x1] }
 0x799   : > { %v760_v45 = vsel %vm758_vm13, %v750_v44, %v759_v42 }
 0x79a   : > { %761 = vst [vmem:[%s1483_s22 + $0x8] sm:$0x1] %v760_v45 }
 0x7a1   : > { %v976_v58 = vld [vmem:[%s1483_s22 + $0x8] sm:$0x1] }
 0x7ba   : > { %v1193_v47 = vpop.f32.mrb[12].mxu0 }
 0x7bb   : > { %v951_v49 = vmul.f32 %v1280_v12, %v1193_v47  ;;  %v932_v50 = vpop.f32.mrb[13].mxu0 }
 0x7bc   : > { %v949_v51 = vmul.f32 %v1282_v48, %v932_v50  ;;  %v1194_v52 = vpop.f32.mrb[14].mxu0 }
 0x7bd   : > { %v1098_v54 = vpack.c.bf16 %v951_v49, %v951_v49  ;;  %v935_v55 = vpop.f32.mrb[15].mxu0 }
 0x7be   : > { %v1096_v21 = vpack.c.bf16 %v949_v51, %v949_v51  ;;  %v950_v56 = vmul.f32 %v1284_v53, %v935_v55 }
 0x7bf   : > { %966 = vrot.lane.b32.xlu1 %v1098_v54, %s1294_s13 }
 0x7c0   : > { %v1097_v57 = vpack.c.bf16 %v950_v56, %v950_v56  ;;  %962 = vrot.lane.b32.xlu0 %v1096_v21, %s1294_s13 }
 0x7c3   : > { %964 = vrot.lane.b32.xlu1 %v1097_v57, %s1294_s13 }
 0x831   : > { %v967_v59 = vpop.permute.xlu1 %966 }
 0x832   : > { %v977_v60 = vsel %vm975_vm15, %v967_v59, %v976_v58  ;;  %v963_v61 = vpop.permute.xlu0 %962 }
 0x833   : > { %978 = vst [vmem:[%s1483_s22 + $0x8] sm:$0x1] %v977_v60  ;;  %972 = vst.msk [vmem:[%s1483_s22] sm:$0xf] %vm971_vm0, %v963_v61 }
 0x835   : > { %v965_v62 = vpop.permute.xlu1 %964 }
 0x836   : > { %973 = vst.msk [vmem:[%s1483_s22 + $0x4] sm:$0xf] %vm971_vm0, %v965_v62 }
 0x837 PF: > { %s11_s6 = sadd.s32 1, %s1291_s6  }
 0x838   : > { %p8_p4 = scmp.ge.s32.totalorder %s11_s6, 4  }
 0x83a   :  { %10 = sbr.rel (!%p8_p4) target bundleno = 1 (0x1), region = 54 }

// kernel: vit_forward.15
= control target key start
LH: loop header
LB: loop body
LE: loop exit
PB: predicated region body
PF: predicated region fallthrough
CT: control target
= control target key end

     0   :  { %v216_v0 = vmov 0.0   ;;  %vm217_vm0 = vmmov 0   ;;  %vm75_vm1 = vcmask 523264   ;;  %vm155_vm2 = vcmask 517120   ;;  %s307_s1 = inlined_call_operand.vmem [shape: bf16[64,64], index: 1, kind: input, shape index: {}]   ;;  %s308_s0 = inlined_call_operand.vmem [shape: bf16[34,64], index: 0, kind: input, shape index: {}]   ;;  %s309_s2 = inlined_call_operand.vmem [shape: f32[1,64], index: 2, kind: input, shape index: {}]   ;;  %s310_s3 = inlined_call_operand.vmem [shape: f32[34,64], index: 3, kind: input, shape index: {}]   ;;  %s311_s4 = inlined_call_operand.vmem [shape: f32[34,64], index: 4, kind: output, shape index: {}]  }
   0x1   :  { %199 = vmatprep.subr.bf16.mxu1 %v216_v0  ;;  %v209_v1 = vld [vmem:[%s307_s1] sm:$0xff]   ;;  %179 = vmatprep.subr.bf16.mxu0 %v216_v0  ;;  %v210_v2 = vld [vmem:[%s307_s1 + $0x8] sm:$0xff]   ;;  %v211_v3 = vld [vmem:[%s307_s1 + $0x10] sm:$0xff]  }
   0x2   :  { %191 = vmatprep.mubr.msk.bf16.mxu1 %vm217_vm0, %v216_v0  ;;  %187 = vmatprep.mubr.msk.bf16.mxu0 %vm217_vm0, %v216_v0  ;;  %v212_v4 = vld [vmem:[%s307_s1 + $0x18] sm:$0xff]   ;;  %v213_v5 = vld [vmem:[%s308_s0 + $0x8] sm:$0xff]   ;;  %v214_v6 = vld [vmem:[%s308_s0] sm:$0xff]  }
   0x3   :  { %203 = vmatpush3.bf16.msra.mxu1 %v209_v1  ;;  %180 = vmatpush3.bf16.msra.mxu0 %v209_v1  ;;  %v215_v7 = vld [vmem:[%s308_s0 + $0x10] ss:$0 sps:$4 sm:$0x11]   ;;  %v161_v8 = vld [vmem:[%s309_s2] ss:$0 sm:$0xff]  ;;  %v144_v18 = vld [vmem:[%s310_s3 + $0x18] sm:$0xff] }
   0x4   :  { %200 = vmatprep.subr.bf16.mxu1 %v216_v0  ;;  %181 = vmatprep.subr.bf16.mxu0 %v216_v0  ;;  %v143_v10 = vld [vmem:[%s310_s3 + $0x10] sm:$0xff]  ;;  %v141_v12 = vld [vmem:[%s310_s3] sm:$0xff]  ;;  %v142_v20 = vld [vmem:[%s310_s3 + $0x8] sm:$0xff] }
   0x5   :  { %v145_v30 = vld [vmem:[%s310_s3 + $0x20] sm:$0x3] }
   0x7   :  { %204 = vmatpush3.bf16.msra.mxu1 %v210_v2  ;;  %182 = vmatpush3.bf16.msra.mxu0 %v210_v2 }
   0x8   :  { %201 = vmatprep.subr.bf16.mxu1 %v216_v0  ;;  %183 = vmatprep.subr.bf16.mxu0 %v216_v0 }
   0xb   :  { %205 = vmatpush3.bf16.msra.mxu1 %v211_v3  ;;  %184 = vmatpush3.bf16.msra.mxu0 %v211_v3 }
   0xc   :  { %202 = vmatprep.subr.bf16.mxu1 %v216_v0  ;;  %185 = vmatprep.subr.bf16.mxu0 %v216_v0 }
   0xf   :  { %206 = vmatpush3.bf16.msra.mxu1 %v212_v4  ;;  %186 = vmatpush3.bf16.msra.mxu0 %v212_v4 }
  0x12   :  { %192 = vmatmul.mubr.msk.bf16.vlgmr.msra.gmra.mrb[0].mxu1 %vm75_vm1, %v213_v5  ;;  %188 = vmatmul.mubr.msk.bf16.vlgmr.msra.gmra.mrb[0].mxu0 %vm75_vm1, %v214_v6 }
  0x13   :  { %195 = vmatprep.mubr.msk.bf16.mxu1 %vm217_vm0, %v216_v0 }
  0x1a   :  { %196 = vmatmul.mubr.msk.bf16.gmra.mrb[4].mxu1 %vm75_vm1, %v215_v7 }
  0xe5   :  { %v127_v9 = vpop.f32.mrb[0].mxu1  ;;  %v119_v11 = vpop.f32.mrb[0].mxu0 }
  0xe6   :  { %v128_v13 = vadd.f32 %v161_v8, %v127_v9  ;;  %v193_v14 = vpop.f32.mrb[1].mxu1  ;;  %v120_v15 = vadd.f32 %v161_v8, %v119_v11  ;;  %v189_v16 = vpop.f32.mrb[1].mxu0 }
  0xe7   :  { %v130_v17 = vpop.f32.mrb[2].mxu1  ;;  %v122_v19 = vpop.f32.mrb[2].mxu0 }
  0xe8   :  { %v148_v21 = vadd.f32 %v143_v10, %v128_v13  ;;  %v131_v22 = vadd.f32 %v161_v8, %v130_v17  ;;  %v146_v23 = vadd.f32 %v141_v12, %v120_v15  ;;  %v194_v24 = vpop.f32.mrb[3].mxu1  ;;  %v123_v25 = vadd.f32 %v161_v8, %v122_v19  ;;  %v190_v26 = vpop.f32.mrb[3].mxu0 }
  0xea   :  { %153 = vst.msk [vmem:[%s311_s4 + $0x10] sm:$0xff] %vm75_vm1, %v148_v21  ;;  %v149_v27 = vadd.f32 %v144_v18, %v131_v22  ;;  %151 = vst.msk [vmem:[%s311_s4] sm:$0xff] %vm75_vm1, %v146_v23  ;;  %v147_v28 = vadd.f32 %v142_v20, %v123_v25 }
  0xec   :  { %154 = vst.msk [vmem:[%s311_s4 + $0x18] sm:$0xff] %vm75_vm1, %v149_v27  ;;  %152 = vst.msk [vmem:[%s311_s4 + $0x8] sm:$0xff] %vm75_vm1, %v147_v28 }
  0xed   :  { %v135_v29 = vpop.f32.mrb[4].mxu1 }
  0xee   :  { %v136_v31 = vadd.f32 %v161_v8, %v135_v29  ;;  %v197_v32 = vpop.f32.mrb[5].mxu1 }
  0xef   :  { %v138_v33 = vpop.f32.mrb[6].mxu1 }
  0xf0   :  { %v150_v34 = vadd.f32 %v145_v30, %v136_v31  ;;  %v198_v35 = vpop.f32.mrb[7].mxu1 }
  0xf2   :  { %156 = vst.msk [vmem:[%s311_s4 + $0x20] sm:$0x3] %vm155_vm2, %v150_v34 }

// kernel: vit_forward.16
= control target key start
LH: loop header
LB: loop body
LE: loop exit
PB: predicated region body
PF: predicated region fallthrough
CT: control target
= control target key end

     0   :  { %vm30_vm0 = vcmask 523264   ;;  %vm43_vm1 = vcmask 517120   ;;  %v480_v43 = vmov 0   ;;  %vm143_vm2 = vcmask 519168   ;;  %s619_s0 = inlined_call_operand.vmem [shape: f32[34,64], index: 0, kind: input, shape index: {}]   ;;  %s620_s1 = inlined_call_operand.vmem [shape: bf16[64,256], index: 1, kind: input, shape index: {}]   ;;  %s621_s3 = inlined_call_operand.vmem [shape: f32[1,64], index: 3, kind: input, shape index: {}]   ;;  %s622_s4 = inlined_call_operand.vmem [shape: f32[1,64], index: 4, kind: input, shape index: {}]   ;;  %s623_s2 = inlined_call_operand.vmem [shape: f32[1,256], index: 2, kind: input, shape index: {}]   ;;  %s624_s5 = inlined_call_operand.vmem [shape: bf16[34,256], index: 5, kind: output, shape index: {}]  }
   0x1   :  { %v27_v0 = vld [vmem:[%s619_s0 + $0x10] sm:$0xff]  ;;  %v28_v1 = vld [vmem:[%s619_s0 + $0x18] sm:$0xff]  ;;  %v25_v2 = vld [vmem:[%s619_s0] sm:$0xff]  ;;  %280 = vmatprep.mubr.bf16.mxu1 %v480_v43  ;;  %270 = vmatprep.mubr.bf16.mxu0 %v480_v43  ;;  %vm148_vm3 = vcmask 516096  }
   0x2   :  { %v37_v3 = vsel %vm30_vm0, %v27_v0, 0.0  ;;  %v31_v4 = vsel %vm30_vm0, %v25_v2, 0.0  ;;  %v26_v5 = vld [vmem:[%s619_s0 + $0x8] sm:$0xff]  ;;  %v40_v6 = vsel %vm30_vm0, %v28_v1, 0.0  ;;  %v29_v8 = vld [vmem:[%s619_s0 + $0x20] sm:$0x3] }
   0x3   :  { %38 = vadd.xlane.f32.xlu0 %v37_v3  ;;  %32 = vadd.xlane.f32.xlu1 %v31_v4  ;;  %v34_v7 = vsel %vm30_vm0, %v26_v5, 0.0  ;;  %v44_v9 = vsel %vm43_vm1, %v29_v8, 0.0  ;;  %v435_v35 = vld [vmem:[%s620_s1 + $0x4] ss:$8 sps:$4 sm:$0xff]   ;;  %v437_v36 = vld [vmem:[%s620_s1] ss:$8 sps:$4 sm:$0xff]  }
   0x4   :  { %426 = vmatprep.subr.bf16.mxu1 %v435_v35  ;;  %238 = vmatprep.subr.bf16.mxu0 %v435_v35  ;;  %v438_v37 = vld [vmem:[%s620_s1 + $0x14] ss:$8 sps:$4 sm:$0xff]   ;;  %v440_v38 = vld [vmem:[%s620_s1 + $0x10] ss:$8 sps:$4 sm:$0xff]   ;;  %v441_v39 = vld [vmem:[%s620_s1 + $0x24] ss:$8 sps:$4 sm:$0xff]  }
   0x5   :  { %430 = vmatpush1.bf16.msra.mxu1 %v437_v36  ;;  %239 = vmatpush1.bf16.msra.mxu0 %v437_v36  ;;  %v443_v40 = vld [vmem:[%s620_s1 + $0x20] ss:$8 sps:$4 sm:$0xff]   ;;  %v444_v41 = vld [vmem:[%s620_s1 + $0x34] ss:$8 sps:$4 sm:$0xff]   ;;  %v446_v42 = vld [vmem:[%s620_s1 + $0x30] ss:$8 sps:$4 sm:$0xff]  }
   0x6   :  { %427 = vmatprep.subr.bf16.mxu1 %v438_v37  ;;  %240 = vmatprep.subr.bf16.mxu0 %v438_v37  ;;  %v390_v60 = vld [vmem:[%s621_s3] ss:$0 sm:$0xff] }
   0x7   :  { %41 = vadd.xlane.f32.xlu0 %v40_v6  ;;  %35 = vadd.xlane.f32.xlu1 %v34_v7  ;;  %v391_v62 = vld [vmem:[%s622_s4] ss:$0 sm:$0xff] }
   0x9   :  { %431 = vmatpush1.bf16.msra.mxu1 %v440_v38  ;;  %241 = vmatpush1.bf16.msra.mxu0 %v440_v38 }
   0xa   :  { %428 = vmatprep.subr.bf16.mxu1 %v441_v39  ;;  %242 = vmatprep.subr.bf16.mxu0 %v441_v39 }
   0xb   :  { %45 = vadd.xlane.f32.xlu0 %v44_v9 }
   0xd   :  { %432 = vmatpush1.bf16.msra.mxu1 %v443_v40  ;;  %243 = vmatpush1.bf16.msra.mxu0 %v443_v40 }
   0xe   :  { %429 = vmatprep.subr.bf16.mxu1 %v444_v41  ;;  %244 = vmatprep.subr.bf16.mxu0 %v444_v41 }
  0x11   :  { %433 = vmatpush1.bf16.msra.mxu1 %v446_v42  ;;  %245 = vmatpush1.bf16.msra.mxu0 %v446_v42 }
  0x90   :  { %v39_v10 = vpop.xlane.xlu0 %38  ;;  %v33_v11 = vpop.xlane.xlu1 %32 }
  0x91   :  { %v50_v12 = vmul.f32 0.015625, %v39_v10  ;;  %v48_v13 = vmul.f32 0.015625, %v33_v11 }
  0x93   :  { %v531_v14 = vsub.f32 %v27_v0, %v50_v12  ;;  %v533_v15 = vsub.f32 %v25_v2, %v48_v13 }
  0x94   :  { %v42_v16 = vpop.xlane.xlu0 %41  ;;  %v36_v17 = vpop.xlane.xlu1 %35 }
  0x95   :  { %v51_v18 = vmul.f32 0.015625, %v42_v16  ;;  %v60_v19 = vmul.f32 %v531_v14, %v531_v14  ;;  %v49_v20 = vmul.f32 0.015625, %v36_v17  ;;  %v58_v21 = vmul.f32 %v533_v15, %v533_v15 }
  0x97   :  { %v539_v22 = vsub.f32 %v28_v1, %v51_v18  ;;  %v69_v23 = vsel %vm30_vm0, %v60_v19, 0.0  ;;  %v542_v24 = vsub.f32 %v26_v5, %v49_v20  ;;  %v63_v28 = vsel %vm30_vm0, %v58_v21, 0.0 }
  0x98   :  { %v46_v25 = vpop.xlane.xlu0 %45  ;;  %70 = vadd.xlane.f32.xlu1 %v69_v23 }
  0x99   :  { %v52_v26 = vmul.f32 0.015625, %v46_v25  ;;  %v61_v27 = vmul.f32 %v539_v22, %v539_v22  ;;  %v59_v29 = vmul.f32 %v542_v24, %v542_v24  ;;  %v165_v25 = vlaneseq }
  0x9b   :  { %v549_v30 = vsub.f32 %v29_v8, %v52_v26  ;;  %v72_v31 = vsel %vm30_vm0, %v61_v27, 0.0  ;;  %v66_v33 = vsel %vm30_vm0, %v59_v29, 0.0  ;;  %v166_v26 = vshrl.u32 %v165_v25, 7 }
  0x9c   :  { %73 = vadd.xlane.f32.xlu0 %v72_v31  ;;  %64 = vadd.xlane.f32.xlu1 %v63_v28  ;;  %v163_v28 = vld [vmem:[%s623_s2] sm:$0x3] }
  0x9d   :  { %v62_v32 = vmul.f32 %v549_v30, %v549_v30  ;;  %v167_v27 = vsub.s32 0, %v166_v26  ;;  %v171_v29 = vsub.s32 1, %v166_v26 }
  0x9f   :  { %v75_v34 = vsel %vm43_vm1, %v62_v32, 0.0  ;;  %v172_v31 = vrot.slane %v163_v28, %v171_v29 }
  0xa0   :  { %76 = vadd.xlane.f32.xlu1 %v75_v34  ;;  %67 = vadd.xlane.f32.xlu0 %v66_v33 }
 0x125   :  { %v71_v44 = vpop.xlane.xlu1 %70 }
 0x126   :  { %v80_v45 = vmul.f32 0.015625, %v71_v44 }
 0x128   :  { %v85_v46 = vadd.f32 1e-05, %v80_v45 }
 0x129   :  { %v74_v47 = vpop.xlane.xlu0 %73  ;;  %v65_v48 = vpop.xlane.xlu1 %64 }
 0x12a   :  { %450 = vrsqrt.f32 %v85_v46  ;;  %v81_v49 = vmul.f32 0.015625, %v74_v47  ;;  %v78_v50 = vmul.f32 0.015625, %v65_v48 }
 0x12c   :  { %v86_v51 = vadd.f32 1e-05, %v81_v49  ;;  %v83_v52 = vadd.f32 1e-05, %v78_v50 }
 0x12d   :  { %v68_v53 = vpop.xlane.xlu0 %67  ;;  %v77_v54 = vpop.xlane.xlu1 %76 }
 0x12e   :  { %452 = vrsqrt.f32 %v86_v51  ;;  %v79_v55 = vmul.f32 0.015625, %v68_v53  ;;  %v82_v56 = vmul.f32 0.015625, %v77_v54 }
 0x12f   :  { %454 = vrsqrt.f32 %v83_v52 }
 0x130   :  { %v84_v57 = vadd.f32 1e-05, %v79_v55  ;;  %v87_v58 = vadd.f32 1e-05, %v82_v56 }
 0x132   :  { %456 = vrsqrt.f32 %v84_v57 }
 0x133   :  { %458 = vrsqrt.f32 %v87_v58 }
 0x134   :  { %v451_v59 = vpop.eup %450 }
 0x135   :  { %v95_v61 = vmul.f32 %v451_v59, %v531_v14 }
 0x137   :  { %v107_v63 = vmul.f32 %v390_v60, %v95_v61 }
 0x138   :  { %v453_v0 = vpop.eup %452 }
 0x139   :  { %v455_v1 = vpop.eup %454  ;;  %v119_v2 = vadd.f32 %v391_v62, %v107_v63  ;;  %v96_v3 = vmul.f32 %v453_v0, %v539_v22 }
 0x13a   :  { %v93_v4 = vmul.f32 %v455_v1, %v533_v15 }
 0x13b   :  { %v418_v5 = vpack.c.bf16 %v119_v2, %v119_v2  ;;  %v108_v6 = vmul.f32 %v390_v60, %v96_v3 }
 0x13c   :  { %v457_v7 = vpop.eup %456  ;;  %v105_v8 = vmul.f32 %v390_v60, %v93_v4 }
 0x13d   :  { %v459_v9 = vpop.eup %458  ;;  %146 = vst.msk [vmem:[#allocation2 + $0x8] sm:$0xf] %vm143_vm2, %v418_v5  ;;  %v120_v10 = vadd.f32 %v391_v62, %v108_v6  ;;  %v94_v11 = vmul.f32 %v457_v7, %v542_v24 }
 0x13e   :  { %v117_v12 = vadd.f32 %v391_v62, %v105_v8  ;;  %v97_v13 = vmul.f32 %v459_v9, %v549_v30  ;;  %v168_v30 = vrot.slane %v163_v28, %v167_v27 }
 0x13f   :  { %v419_v14 = vpack.c.bf16 %v120_v10, %v120_v10  ;;  %v106_v16 = vmul.f32 %v390_v60, %v94_v11 }
 0x140   :  { %v416_v17 = vpack.c.bf16 %v117_v12, %v117_v12  ;;  %v109_v18 = vmul.f32 %v390_v60, %v97_v13 }
 0x141   :  { %147 = vst.msk [vmem:[#allocation2 + $0xc] sm:$0xf] %vm143_vm2, %v419_v14  ;;  %v118_v15 = vadd.f32 %v391_v62, %v106_v16 }
 0x142   :  { %144 = vst.msk [vmem:[#allocation2] sm:$0xf] %vm143_vm2, %v416_v17  ;;  %v121_v19 = vadd.f32 %v391_v62, %v109_v18 }
 0x143   :  { %v417_v20 = vpack.c.bf16 %v118_v15, %v118_v15 }
 0x144   :  { %v420_v21 = vpack.c.bf16 %v121_v19, %v121_v19 }
 0x145   :  { %145 = vst.msk [vmem:[#allocation2 + $0x4] sm:$0xf] %vm143_vm2, %v417_v20 }
 0x146   :  { %149 = vst.msk [vmem:[#allocation2 + $0x10] sm:$0x1] %vm148_vm3, %v420_v21 }
 0x148   :  { %v447_v22 = vld [vmem:[#allocation2 + $0x8] sm:$0xff]  }
 0x149   :  { %409 = vmatmul.mubr.msk.bf16.vlgmr.msra.gmra.mrb[0].mxu1 %vm30_vm0, %v447_v22 }
 0x14a   :  { %290 = vmatprep.mubr.bf16.mxu1 %v480_v43 }
 0x14c   :  { %v448_v23 = vld [vmem:[#allocation2] sm:$0xff]  }
 0x14d   :  { %408 = vmatmul.mubr.msk.bf16.vlgmr.msra.gmra.mrb[0].mxu0 %vm30_vm0, %v448_v23  ;;  %v449_v24 = vld [vmem:[#allocation2 + $0x10] ss:$0 sps:$4 sm:$0x11]  }
 0x151   :  { %410 = vmatmul.mubr.msk.bf16.gmra.mrb[4].mxu1 %vm30_vm0, %v449_v24 }
 0x21c   :  { %v282_v32 = vpop.f32.mrb[0].mxu1 }
 0x21d   :  { %v283_v33 = vadd.f32 %v282_v32, %v168_v30  ;;  %v284_v34 = vpop.f32.mrb[1].mxu1 }
 0x21e   :  { %v285_v35 = vadd.f32 %v284_v34, %v172_v31  ;;  %v286_v36 = vpop.f32.mrb[2].mxu1 }
 0x21f   :  { %v313_v37 = vmul.f32 0.70710677, %v283_v33  ;;  %v287_v38 = vadd.f32 %v286_v36, %v168_v30  ;;  %v288_v39 = vpop.f32.mrb[3].mxu1  ;;  %v303_v2 = vmul.f32 0.5, %v283_v33 }
 0x220   :  { %v314_v40 = vmul.f32 0.70710677, %v285_v35  ;;  %v289_v41 = vadd.f32 %v288_v39, %v172_v31  ;;  %v272_v42 = vpop.f32.mrb[0].mxu0  ;;  %v304_v5 = vmul.f32 0.5, %v285_v35 }
 0x221   :  { %460 = verf.f32 %v313_v37  ;;  %v315_v43 = vmul.f32 0.70710677, %v287_v38  ;;  %v273_v44 = vadd.f32 %v272_v42, %v168_v30  ;;  %v274_v45 = vpop.f32.mrb[1].mxu0  ;;  %v305_v9 = vmul.f32 0.5, %v287_v38 }
 0x222   :  { %462 = verf.f32 %v314_v40  ;;  %v316_v46 = vmul.f32 0.70710677, %v289_v41  ;;  %v275_v47 = vadd.f32 %v274_v45, %v172_v31  ;;  %v276_v48 = vpop.f32.mrb[2].mxu0  ;;  %v306_v13 = vmul.f32 0.5, %v289_v41 }
 0x223   :  { %464 = verf.f32 %v315_v43  ;;  %v309_v49 = vmul.f32 0.70710677, %v273_v44  ;;  %v277_v50 = vadd.f32 %v276_v48, %v168_v30  ;;  %v278_v51 = vpop.f32.mrb[3].mxu0  ;;  %v299_v18 = vmul.f32 0.5, %v273_v44 }
 0x224   :  { %466 = verf.f32 %v316_v46  ;;  %v310_v52 = vmul.f32 0.70710677, %v275_v47  ;;  %v279_v53 = vadd.f32 %v278_v51, %v172_v31  ;;  %v292_v54 = vpop.f32.mrb[4].mxu1  ;;  %v300_v22 = vmul.f32 0.5, %v275_v47 }
 0x225   :  { %468 = verf.f32 %v309_v49  ;;  %v311_v55 = vmul.f32 0.70710677, %v277_v50  ;;  %v293_v56 = vadd.f32 %v292_v54, %v168_v30  ;;  %v294_v57 = vpop.f32.mrb[5].mxu1  ;;  %v301_v26 = vmul.f32 0.5, %v277_v50 }
 0x226   :  { %470 = verf.f32 %v310_v52  ;;  %v312_v58 = vmul.f32 0.70710677, %v279_v53  ;;  %v295_v59 = vadd.f32 %v294_v57, %v172_v31  ;;  %v296_v60 = vpop.f32.mrb[6].mxu1  ;;  %v302_v31 = vmul.f32 0.5, %v279_v53 }
 0x227   :  { %472 = verf.f32 %v311_v55  ;;  %v317_v61 = vmul.f32 0.70710677, %v293_v56  ;;  %v297_v62 = vpop.f32.mrb[7].mxu1  ;;  %v307_v35 = vmul.f32 0.5, %v293_v56 }
 0x228   :  { %474 = verf.f32 %v312_v58  ;;  %v318_v63 = vmul.f32 0.70710677, %v295_v59  ;;  %v308_v39 = vmul.f32 0.5, %v295_v59 }
 0x229   :  { %476 = verf.f32 %v317_v61 }
 0x22a   :  { %478 = verf.f32 %v318_v63 }
 0x22b   :  { %v461_v0 = vpop.eup %460 }
 0x22c   :  { %v463_v1 = vpop.eup %462  ;;  %v333_v3 = vadd.f32 1.0, %v461_v0 }
 0x22d   :  { %v465_v4 = vpop.eup %464  ;;  %v334_v6 = vadd.f32 1.0, %v463_v1 }
 0x22e   :  { %v467_v7 = vpop.eup %466  ;;  %v343_v8 = vmul.f32 %v333_v3, %v303_v2  ;;  %v335_v10 = vadd.f32 1.0, %v465_v4 }
 0x22f   :  { %v469_v11 = vpop.eup %468  ;;  %v344_v12 = vmul.f32 %v334_v6, %v304_v5  ;;  %v336_v14 = vadd.f32 1.0, %v467_v7 }
 0x230   :  { %v471_v16 = vpop.eup %470  ;;  %v345_v17 = vmul.f32 %v335_v10, %v305_v9  ;;  %v329_v15 = vadd.f32 1.0, %v469_v11 }
 0x231   :  { %v473_v19 = vpop.eup %472  ;;  %v423_v20 = vpack.c.bf16 %v344_v12, %v343_v8  ;;  %v346_v21 = vmul.f32 %v336_v14, %v306_v13  ;;  %v330_v23 = vadd.f32 1.0, %v471_v16 }
 0x232   :  { %v475_v24 = vpop.eup %474  ;;  %v339_v25 = vmul.f32 %v329_v15, %v299_v18  ;;  %v331_v27 = vadd.f32 1.0, %v473_v19 }
 0x233   :  { %v477_v28 = vpop.eup %476  ;;  %383 = vst [vmem:[%s624_s5 + $0x10] sm:$0xff] %v423_v20  ;;  %v424_v29 = vpack.c.bf16 %v346_v21, %v345_v17  ;;  %v340_v30 = vmul.f32 %v330_v23, %v300_v22  ;;  %v332_v32 = vadd.f32 1.0, %v475_v24 }
 0x234   :  { %v479_v33 = vpop.eup %478  ;;  %v341_v34 = vmul.f32 %v331_v27, %v301_v26  ;;  %v337_v36 = vadd.f32 1.0, %v477_v28 }
 0x235   :  { %384 = vst [vmem:[%s624_s5 + $0x18] sm:$0xff] %v424_v29  ;;  %v421_v37 = vpack.c.bf16 %v340_v30, %v339_v25  ;;  %v342_v38 = vmul.f32 %v332_v32, %v302_v31  ;;  %v338_v40 = vadd.f32 1.0, %v479_v33 }
 0x236   :  { %v347_v41 = vmul.f32 %v337_v36, %v307_v35 }
 0x237   :  { %381 = vst [vmem:[%s624_s5] sm:$0xff] %v421_v37  ;;  %v422_v42 = vpack.c.bf16 %v342_v38, %v341_v34  ;;  %v348_v43 = vmul.f32 %v338_v40, %v308_v39 }
 0x239   :  { %382 = vst [vmem:[%s624_s5 + $0x8] sm:$0xff] %v422_v42  ;;  %v425_v44 = vpack.c.bf16 %v348_v43, %v347_v41 }
 0x23b   :  { %385 = vst [vmem:[%s624_s5 + $0x20] sm:$0x11] %v425_v44 }

// kernel: vit_forward.17
= control target key start
LH: loop header
LB: loop body
LE: loop exit
PB: predicated region body
PF: predicated region fallthrough
CT: control target
= control target key end

     0   :  { %vm251_vm0 = vcmask 523264   ;;  %vm256_vm1 = vcmask 517120   ;;  %s480_s1 = inlined_call_operand.vmem [shape: bf16[256,64], index: 1, kind: input, shape index: {}]   ;;  %s481_s0 = inlined_call_operand.vmem [shape: bf16[34,256], index: 0, kind: input, shape index: {}]   ;;  %s482_s2 = inlined_call_operand.vmem [shape: f32[1,64], index: 2, kind: input, shape index: {}]   ;;  %s483_s3 = inlined_call_operand.vmem [shape: f32[34,64], index: 3, kind: input, shape index: {}]   ;;  %s484_s4 = inlined_call_operand.vmem [shape: f32[34,64], index: 4, kind: output, shape index: {}]  }
   0x1   :  { %v335_v0 = vld [vmem:[%s480_s1 + $0x40] sm:$0xff]   ;;  %v337_v2 = vld [vmem:[%s480_s1 + $0x48] sm:$0xff]   ;;  %v339_v4 = vld [vmem:[%s480_s1 + $0x50] sm:$0xff]  }
   0x2   :  { %v336_v1 = vld [vmem:[%s480_s1] sm:$0xff]   ;;  %319 = vmatprep.subr.bf16.mxu1 %v335_v0  ;;  %285 = vmatprep.subr.bf16.mxu0 %v335_v0  ;;  %v338_v3 = vld [vmem:[%s480_s1 + $0x8] sm:$0xff]   ;;  %v340_v5 = vld [vmem:[%s480_s1 + $0x10] sm:$0xff]  }
   0x3   :  { %327 = vmatpush3.bf16.msra.mxu1 %v336_v1  ;;  %286 = vmatpush3.bf16.msra.mxu0 %v336_v1  ;;  %v341_v6 = vld [vmem:[%s480_s1 + $0x58] sm:$0xff]   ;;  %v343_v8 = vld [vmem:[%s480_s1 + $0x60] sm:$0xff]   ;;  %v345_v10 = vld [vmem:[%s480_s1 + $0x68] sm:$0xff]  }
   0x4   :  { %320 = vmatprep.subr.bf16.mxu1 %v337_v2  ;;  %287 = vmatprep.subr.bf16.mxu0 %v337_v2  ;;  %v342_v7 = vld [vmem:[%s480_s1 + $0x18] sm:$0xff]   ;;  %v344_v9 = vld [vmem:[%s480_s1 + $0x20] sm:$0xff]   ;;  %v346_v13 = vld [vmem:[%s480_s1 + $0x28] sm:$0xff]  }
   0x5   :  { %v353_v11 = vld [vmem:[%s481_s0 + $0x14] ss:$8 sps:$4 sm:$0xff]   ;;  %v356_v12 = vld [vmem:[%s481_s0 + $0x4] ss:$8 sps:$4 sm:$0xff]   ;;  %v351_v19 = vld [vmem:[%s481_s0 + $0x10] ss:$8 sps:$4 sm:$0xff]  }
   0x6   :  { %v347_v14 = vld [vmem:[%s480_s1 + $0x70] sm:$0xff]   ;;  %225 = vmatprep.mubr.bf16.mxu1 %v353_v11  ;;  %217 = vmatprep.mubr.bf16.mxu0 %v356_v12  ;;  %v349_v16 = vld [vmem:[%s480_s1 + $0x78] sm:$0xff]   ;;  %v22_v18 = vld [vmem:[%s481_s0 + $0x20] sm:$0x11] }
   0x7   :  { %328 = vmatpush3.bf16.msra.mxu1 %v338_v3  ;;  %288 = vmatpush3.bf16.msra.mxu0 %v338_v3  ;;  %v348_v15 = vld [vmem:[%s480_s1 + $0x30] sm:$0xff]   ;;  %v350_v17 = vld [vmem:[%s480_s1 + $0x38] sm:$0xff]   ;;  %v354_v20 = vld [vmem:[%s481_s0] ss:$8 sps:$4 sm:$0xff]   ;;  %v268_v21 = vcombine.high %v22_v18, %v22_v18  ;;  %v267_v22 = vcombine.low %v22_v18, %v22_v18 }
   0x8   :  { %321 = vmatprep.subr.bf16.mxu1 %v339_v4  ;;  %289 = vmatprep.subr.bf16.mxu0 %v339_v4  ;;  %v262_v25 = vld [vmem:[%s482_s2] ss:$0 sm:$0xff]  ;;  %v243_v32 = vld [vmem:[%s483_s3 + $0x10] sm:$0xff]  ;;  %v244_v40 = vld [vmem:[%s483_s3 + $0x18] sm:$0xff] }
   0x9   :  { %v241_v34 = vld [vmem:[%s483_s3] sm:$0xff]  ;;  %v242_v41 = vld [vmem:[%s483_s3 + $0x8] sm:$0xff] }
   0xa   :  { %v245_v52 = vld [vmem:[%s483_s3 + $0x20] sm:$0x3] }
   0xb   :  { %329 = vmatpush3.bf16.msra.mxu1 %v340_v5  ;;  %290 = vmatpush3.bf16.msra.mxu0 %v340_v5 }
   0xc   :  { %322 = vmatprep.subr.bf16.mxu1 %v341_v6  ;;  %291 = vmatprep.subr.bf16.mxu0 %v341_v6 }
   0xf   :  { %330 = vmatpush3.bf16.msra.mxu1 %v342_v7  ;;  %292 = vmatpush3.bf16.msra.mxu0 %v342_v7 }
  0x10   :  { %323 = vmatprep.subr.bf16.mxu1 %v343_v8  ;;  %293 = vmatprep.subr.bf16.mxu0 %v343_v8 }
  0x13   :  { %331 = vmatpush3.bf16.msra.mxu1 %v344_v9  ;;  %294 = vmatpush3.bf16.msra.mxu0 %v344_v9 }
  0x14   :  { %324 = vmatprep.subr.bf16.mxu1 %v345_v10  ;;  %295 = vmatprep.subr.bf16.mxu0 %v345_v10 }
  0x17   :  { %332 = vmatpush3.bf16.msra.mxu1 %v346_v13  ;;  %296 = vmatpush3.bf16.msra.mxu0 %v346_v13 }
  0x18   :  { %325 = vmatprep.subr.bf16.mxu1 %v347_v14  ;;  %297 = vmatprep.subr.bf16.mxu0 %v347_v14 }
  0x1b   :  { %333 = vmatpush3.bf16.msra.mxu1 %v348_v15  ;;  %298 = vmatpush3.bf16.msra.mxu0 %v348_v15 }
  0x1c   :  { %326 = vmatprep.subr.bf16.mxu1 %v349_v16  ;;  %299 = vmatprep.subr.bf16.mxu0 %v349_v16 }
  0x1f   :  { %334 = vmatpush3.bf16.msra.mxu1 %v350_v17  ;;  %300 = vmatpush3.bf16.msra.mxu0 %v350_v17 }
  0x22   :  { %226 = vmatmul.mubr.bf16.vlgmr.msra.gmra.mrb[0].mxu1 %v351_v19  ;;  %218 = vmatmul.mubr.bf16.vlgmr.msra.gmra.mrb[0].mxu0 %v354_v20 }
  0x23   :  { %233 = vmatprep.mubr.bf16.mxu1 %v268_v21 }
  0x2a   :  { %234 = vmatmul.mubr.bf16.gmra.mrb[4].mxu1 %v267_v22 }
  0xf5   :  { %v307_v23 = vpop.f32.mrb[0].mxu1  ;;  %v301_v24 = vpop.f32.mrb[0].mxu0 }
  0xf6   :  { %v308_v26 = vpop.f32.mrb[1].mxu1  ;;  %v302_v27 = vpop.f32.mrb[1].mxu0 }
  0xf7   :  { %v309_v28 = vadd.f32 %v308_v26, %v307_v23  ;;  %v310_v29 = vpop.f32.mrb[2].mxu1  ;;  %v303_v30 = vadd.f32 %v302_v27, %v301_v24  ;;  %v304_v31 = vpop.f32.mrb[2].mxu0 }
  0xf8   :  { %v311_v33 = vpop.f32.mrb[3].mxu1  ;;  %v305_v35 = vpop.f32.mrb[3].mxu0 }
  0xf9   :  { %v228_v36 = vadd.f32 %v309_v28, %v262_v25  ;;  %v312_v37 = vadd.f32 %v311_v33, %v310_v29  ;;  %v220_v38 = vadd.f32 %v303_v30, %v262_v25  ;;  %v306_v39 = vadd.f32 %v305_v35, %v304_v31 }
  0xfb   :  { %v248_v42 = vadd.f32 %v243_v32, %v228_v36  ;;  %v231_v43 = vadd.f32 %v312_v37, %v262_v25  ;;  %v246_v44 = vadd.f32 %v241_v34, %v220_v38  ;;  %v223_v45 = vadd.f32 %v306_v39, %v262_v25 }
  0xfd   :  { %254 = vst.msk [vmem:[%s484_s4 + $0x10] sm:$0xff] %vm251_vm0, %v248_v42  ;;  %v249_v46 = vadd.f32 %v244_v40, %v231_v43  ;;  %252 = vst.msk [vmem:[%s484_s4] sm:$0xff] %vm251_vm0, %v246_v44  ;;  %v247_v47 = vadd.f32 %v242_v41, %v223_v45  ;;  %v313_v48 = vpop.f32.mrb[4].mxu1 }
  0xfe   :  { %v314_v49 = vpop.f32.mrb[5].mxu1 }
  0xff   :  { %255 = vst.msk [vmem:[%s484_s4 + $0x18] sm:$0xff] %vm251_vm0, %v249_v46  ;;  %253 = vst.msk [vmem:[%s484_s4 + $0x8] sm:$0xff] %vm251_vm0, %v247_v47  ;;  %v315_v50 = vadd.f32 %v314_v49, %v313_v48  ;;  %v316_v51 = vpop.f32.mrb[6].mxu1 }
 0x100   :  { %v317_v53 = vpop.f32.mrb[7].mxu1 }
 0x101   :  { %v236_v54 = vadd.f32 %v315_v50, %v262_v25 }
 0x103   :  { %v250_v55 = vadd.f32 %v245_v52, %v236_v54 }
 0x105   :  { %257 = vst.msk [vmem:[%s484_s4 + $0x20] sm:$0x3] %vm256_vm1, %v250_v55 }

// kernel: vit_forward.23
= control target key start
LH: loop header
LB: loop body
LE: loop exit
PB: predicated region body
PF: predicated region fallthrough
CT: control target
= control target key end

     0   :  { %vm27_vm0 = vcmask 517120   ;;  %s288_s0 = inlined_call_operand.vmem [shape: f32[2,64], index: 0, kind: input, shape index: {}]   ;;  %s289_s1 = inlined_call_operand.vmem [shape: bf16[64,10], index: 1, kind: input, shape index: {}]   ;;  %s290_s2 = inlined_call_operand.vmem [shape: f32[1,10], index: 2, kind: input, shape index: {}]   ;;  %s291_s3 = inlined_call_operand.vmem [shape: f32[1,64], index: 3, kind: input, shape index: {}]   ;;  %s292_s4 = inlined_call_operand.vmem [shape: f32[1,64], index: 4, kind: input, shape index: {}]   ;;  %s293_s5 = inlined_call_operand.hbm [shape: f32[2,10], index: 5, kind: output, shape index: {}]  }
   0x1   :  { %v26_v0 = vld [vmem:[%s288_s0] sm:$0x3] }
   0x2   :  { %v28_v1 = vsel %vm27_vm0, %v26_v0, 0.0 }
   0x3   :  { %29 = vadd.xlane.f32.xlu0 %v28_v1 }
   0x4   :  { %10 = vsyncpa [#allocation4], 0  ;;  %v189_v7 = vld [vmem:[%s289_s1] sm:$0xff]   ;;  %v219_v8 = vmov 0.0   ;;  %v190_v9 = vld [vmem:[%s289_s1 + $0x8] sm:$0xff]   ;;  %vm220_vm1 = vmmov 0  }
   0x5   :  { %174 = vmatprep.subr.bf16.mxu0 %v219_v8  ;;  %v191_v10 = vld [vmem:[%s289_s1 + $0x10] sm:$0xff]   ;;  %v192_v11 = vld [vmem:[%s289_s1 + $0x18] sm:$0xff]   ;;  %182 = vmatprep.mubr.msk.bf16.mxu0 %vm220_vm1, %v219_v8  ;;  %v161_v16 = vld [vmem:[%s291_s3] ss:$0 sm:$0xff]  ;;  %vm59_vm2 = vcmask 516096   ;;  %vm101_vm3 = vcmask 523264  }
   0x6   :  { %175 = vmatpush3.bf16.msra.mxu0 %v189_v7  ;;  %v162_v18 = vld [vmem:[%s292_s4] ss:$0 sm:$0xff]  ;;  %s221_s7 = smov [#allocation3]   ;;  %vm145_vm4 = vcmask 74752  }
   0x7   :  { %176 = vmatprep.subr.bf16.mxu0 %v219_v8  ;;  %v163_v23 = vld [vmem:[%s290_s2] ss:$0 sm:$0xff]  ;;  %s153_s8 = sshll.u32 %s221_s7, 4  ;;  %s154_s8 = int_to_ptr.vmem [resolvable:$true] %s153_s8 }
   0x8   :  { %s195_s3 = scalar_lea.vmem %s154_s8, 32  ;;  %p200_p1 = scmp.lt.s32.totalorder %s154_s8, %s154_s8 }
   0x9   :  { %p196_p0 = scmp.ne.s32.totalorder %s154_s8, %s195_s3  ;;  %p201_p2 = scmp.lt.s32.totalorder %s195_s3, %s195_s3 }
   0xa   :  { %177 = vmatpush3.bf16.msra.mxu0 %v190_v9 }
   0xb   :  { %178 = vmatprep.subr.bf16.mxu0 %v219_v8  ;;  %p202_p3 = por %p201_p2, %p200_p1 }
   0xd   :  { %p203_p4 = pnand %p202_p3, %p196_p0 }
   0xe   :  { %179 = vmatpush3.bf16.msra.mxu0 %v191_v10 }
   0xf   :  { %180 = vmatprep.subr.bf16.mxu0 %v219_v8 }
  0x12   :  { %181 = vmatpush3.bf16.msra.mxu0 %v192_v11 }
  0x90   :  { %v30_v2 = vpop.xlane.xlu0 %29 }
  0x91   :  { %v32_v3 = vmul.f32 0.015625, %v30_v2 }
  0x93   :  { %v33_v4 = vsub.f32 %v26_v0, %v32_v3 }
  0x95   :  { %v34_v5 = vmul.f32 %v33_v4, %v33_v4 }
  0x97   :  { %v35_v6 = vsel %vm27_vm0, %v34_v5, 0.0 }
  0x98   :  { %36 = vadd.xlane.f32.xlu0 %v35_v6 }
 0x125   :  { %v37_v12 = vpop.xlane.xlu0 %36 }
 0x126   :  { %v38_v13 = vmul.f32 0.015625, %v37_v12 }
 0x128   :  { %v39_v14 = vadd.f32 1e-05, %v38_v13 }
 0x12a   :  { %193 = vrsqrt.f32 %v39_v14 }
 0x134   :  { %v194_v15 = vpop.eup %193 }
 0x135   :  { %v41_v17 = vmul.f32 %v194_v15, %v33_v4 }
 0x137   :  { %v49_v19 = vmul.f32 %v161_v16, %v41_v17 }
 0x139   :  { %v57_v20 = vadd.f32 %v162_v18, %v49_v19 }
 0x13b   :  { %v58_v21 = vpack.c.bf16 %v57_v20, %v57_v20 }
 0x13d   :  { %60 = vst.msk [vmem:[#allocation2] sm:$0x1] %vm59_vm2, %v58_v21 }
 0x144   :  { %v61_v22 = vld [vmem:[#allocation2] sm:$0x1] }
 0x145   :  { %183 = vmatmul.mubr.msk.bf16.vlgmr.msra.gmra.mrb[0].mxu0 %vm101_vm3, %v61_v22 }
 0x218   :  { %v139_v24 = vpop.f32.mrb[0].mxu0 }
 0x219   :  { %v140_v25 = vadd.f32 %v163_v23, %v139_v24  ;;  %v184_v26 = vpop.f32.mrb[1].mxu0 }
 0x21a   :  { %v142_v27 = vpop.f32.mrb[2].mxu0 }
 0x21b   :  { %v185_v28 = vpop.f32.mrb[3].mxu0  ;;  %146 = vst.msk [vmem:[#allocation3] sm:$0x3] %vm145_vm4, %v140_v25 }
 0x21c   :  { %206 = shalt.err (!%p203_p4)
}
 0x21d   :  { %s207_s2 = scalar_lea.hbm %s293_s5, 32 }
 0x21e   :  { %p208_p5 = scmp.ne.s32.totalorder %s293_s5, %s207_s2  ;;  %p211_p6 = scmp.lt.u32.totalorder %s207_s2, %s293_s5 }
 0x220   :  { %p213_p7 = pnand %p211_p6, %p208_p5 }
 0x222   :  { %216 = shalt.err (!%p213_p7)
}
 0x223   :  { %156 = dma.vmem_to_hbm [thread:$0]  %s154_s8, 32, %s293_s5, [#allocation4]  }
 0x224   :  { %217 = dma.done.wait [#allocation4], 32  }
 0x225   :  { %218 = vsyncadd [#allocation4], 4294967264 }
 0x226   :  { %160 = vsyncpa [#allocation4], 1 }

</bundles_post_ra>
